<compile_context>
chip_gen: v5e
topology: v5e:2x2
jax: 0.10.0
libtpu: 0.0.40
codegen_flags: <defaults>
</compile_context>

<pallas_src>
import functools

import jax
import jax.numpy as jnp
from jax import lax
from jax.experimental import pallas as pl
from jax.experimental.pallas import tpu as pltpu

BN_EPS = 1e-5
_VMEM_BUDGET = 12 << 20        # worst-case per-call tile footprint target (bytes)


def _round_up(x, m):
    return (x + m - 1) // m * m


def _cdiv(a, b):
    return (a + b - 1) // b


# ---------------------------------------------------------------------------
# Pallas kernel 1: tiled matmul (bf16 x bf16 -> f32) with fused bias epilogue
# and fused per-block column sum / sum-of-squares (BatchNorm batch statistics).
# ---------------------------------------------------------------------------
def _mm_bias_stats_kernel(a_ref, b_ref, bias_ref, o_ref, sum_ref, sq_ref):
    """Single-K-block fast path: no accumulator scratch, direct epilogue."""
    z = jnp.dot(a_ref[...], b_ref[...], preferred_element_type=jnp.float32)
    z = z + bias_ref[...]
    o_ref[...] = z.astype(o_ref.dtype)
    sum_ref[...] = jnp.sum(z, axis=0, keepdims=True)[None]
    sq_ref[...] = jnp.sum(z * z, axis=0, keepdims=True)[None]


def _mm_bias_stats_acc_kernel(a_ref, b_ref, bias_ref, o_ref, sum_ref, sq_ref,
                              acc_ref):
    """Multi-K-block path: f32 VMEM accumulator, epilogue at the last k step."""
    @pl.when(pl.program_id(2) == 0)
    def _():
        acc_ref[...] = jnp.zeros_like(acc_ref)

    acc_ref[...] += jnp.dot(a_ref[...], b_ref[...],
                            preferred_element_type=jnp.float32)

    @pl.when(pl.program_id(2) == pl.num_programs(2) - 1)
    def _():
        z = acc_ref[...] + bias_ref[...]
        o_ref[...] = z.astype(o_ref.dtype)
        sum_ref[...] = jnp.sum(z, axis=0, keepdims=True)[None]
        sq_ref[...] = jnp.sum(z * z, axis=0, keepdims=True)[None]


def matmul_bias(a, w, bias, *, out_dtype=jnp.bfloat16):
    """out = (M,K) @ (K,N) + bias[N].  bf16 MXU operands, f32 accumulation.

    Also returns the per-column sum and sum-of-squares of the f32 result
    (fused BatchNorm batch statistics; tiny extra outputs)."""
    M, K = a.shape
    _, N = w.shape

    # Shape-adaptive, lane-dense tiles.
    bk = _round_up(K, 128) if K <= 2048 else 1024       # K: A's lane axis
    bn = _round_up(N, 128) if N <= 512 else 512         # N: output lane axis
    bm = min(_round_up(M, 8), 1024)
    multi_k = _round_up(K, bk) > bk
    out_b = jnp.dtype(out_dtype).itemsize

    def _vmem_bytes(bm_):
        # double-buffered A(bf16)+B(bf16)+out+stats, plus acc scratch if any
        return (2 * (bm_ * bk * 2 + bk * bn * 2 + bm_ * bn * out_b + 3 * bn * 4)
                + (bm_ * bn * 4 if multi_k else 0))

    while bm > 64 and _vmem_bytes(bm) > _VMEM_BUDGET:
        bm = _round_up(bm // 2, 8)

    # v7x megacore: guarantee >= 2 blocks on a "parallel" grid axis.
    if _cdiv(M, bm) == 1 and _cdiv(N, bn) == 1:
        if M > 8:
            bm = _round_up(_cdiv(M, 2), 8)
        elif bn > 128:
            bn //= 2

    Mp, Kp, Np = _round_up(M, bm), _round_up(K, bk), _round_up(N, bn)
    mi, nj, kk = Mp // bm, Np // bn, Kp // bk

    a_p = a.astype(jnp.bfloat16)
    if (Mp, Kp) != (M, K):
        a_p = jnp.pad(a_p, ((0, Mp - M), (0, Kp - K)))
    w_p = w.astype(jnp.bfloat16)
    if (Kp, Np) != (K, N):
        w_p = jnp.pad(w_p, ((0, Kp - K), (0, Np - N)))
    b_p = bias.reshape(1, N).astype(jnp.float32)
    if Np != N:
        b_p = jnp.pad(b_p, ((0, 0), (0, Np - N)))

    out_shape = (jax.ShapeDtypeStruct((Mp, Np), out_dtype),
                 jax.ShapeDtypeStruct((mi, 1, Np), jnp.float32),
                 jax.ShapeDtypeStruct((mi, 1, Np), jnp.float32))

    if kk == 1:
        grid = (mi, nj)
        in_specs = [pl.BlockSpec((bm, bk), lambda i, j: (i, 0)),
                    pl.BlockSpec((bk, bn), lambda i, j: (0, j)),
                    pl.BlockSpec((1, bn), lambda i, j: (0, j))]
        out_specs = (pl.BlockSpec((bm, bn), lambda i, j: (i, j)),
                     pl.BlockSpec((1, 1, bn), lambda i, j: (i, 0, j)),
                     pl.BlockSpec((1, 1, bn), lambda i, j: (i, 0, j)))
        kernel, scratch = _mm_bias_stats_kernel, []
        dim_sem = ("parallel", "parallel")
    else:
        grid = (mi, nj, kk)
        in_specs = [pl.BlockSpec((bm, bk), lambda i, j, k: (i, k)),
                    pl.BlockSpec((bk, bn), lambda i, j, k: (k, j)),
                    pl.BlockSpec((1, bn), lambda i, j, k: (0, j))]
        out_specs = (pl.BlockSpec((bm, bn), lambda i, j, k: (i, j)),
                     pl.BlockSpec((1, 1, bn), lambda i, j, k: (i, 0, j)),
                     pl.BlockSpec((1, 1, bn), lambda i, j, k: (i, 0, j)))
        kernel = _mm_bias_stats_acc_kernel
        scratch = [pltpu.VMEM((bm, bn), jnp.float32)]
        dim_sem = ("parallel", "parallel", "arbitrary")

    out, sums, sqs = pl.pallas_call(
        kernel,
        out_shape=out_shape,
        grid_spec=pltpu.PrefetchScalarGridSpec(
            num_scalar_prefetch=0, grid=grid,
            in_specs=in_specs, out_specs=out_specs,
            scratch_shapes=scratch),
        compiler_params=pltpu.CompilerParams(
            dimension_semantics=dim_sem,
            vmem_limit_bytes=32 * 1024 * 1024),
    )(a_p, w_p, b_p)

    if (Mp, Np) != (M, N):
        out = out[:M, :N]

    col_sum = jnp.sum(sums, axis=(0, 1))[:N]
    col_sq = jnp.sum(sqs, axis=(0, 1))[:N]
    pad_rows = Mp - M
    if pad_rows:
        # Zero-padded A rows produce exactly `bias` per row; remove their
        # contribution from the fused statistics (exact correction).
        bf = bias.astype(jnp.float32)
        col_sum = col_sum - pad_rows * bf
        col_sq = col_sq - pad_rows * bf * bf
    return out, col_sum, col_sq


# ---------------------------------------------------------------------------
# Pallas kernel 2: fused BatchNorm-apply (+ optional residual add) + ReLU.
# ---------------------------------------------------------------------------
def _bn_relu_kernel(z_ref, s_ref, t_ref, o_ref):
    z = z_ref[...].astype(jnp.float32)
    o_ref[...] = jnp.maximum(z * s_ref[...] + t_ref[...], 0.0).astype(o_ref.dtype)


def _bn_add_relu_kernel(z_ref, s_ref, t_ref, r_ref, o_ref):
    z = z_ref[...].astype(jnp.float32)
    r = r_ref[...].astype(jnp.float32)
    o_ref[...] = jnp.maximum(z * s_ref[...] + t_ref[...] + r, 0.0).astype(o_ref.dtype)


def _scale_shift_relu(z2d, scale, shift, residual2d=None, *, out_dtype=jnp.float32):
    """relu(z * scale + shift [+ residual]) over an (M, C) slab in one pass."""
    M, C = z2d.shape

    # Lane-dense repack: C < 128 output would force masked partial stores, so
    # view the contiguous slab as (M*C/128, 128) and tile scale/shift.
    repack = C < 128 and 128 % C == 0 and (M * C) % 128 == 0
    if repack:
        rep = 128 // C
        zv = z2d.reshape(M * C // 128, 128)
        sv = jnp.tile(scale.reshape(1, C).astype(jnp.float32), (1, rep))
        tv = jnp.tile(shift.reshape(1, C).astype(jnp.float32), (1, rep))
        rv = (residual2d.reshape(M * C // 128, 128)
              if residual2d is not None else None)
    else:
        zv = z2d
        sv = scale.reshape(1, C).astype(jnp.float32)
        tv = shift.reshape(1, C).astype(jnp.float32)
        rv = residual2d
    Mv, Cv = zv.shape

    bm = min(_round_up(Mv, 8), 1024)
    n_in_bytes = zv.dtype.itemsize + (rv.dtype.itemsize if rv is not None else 0)
    out_b = jnp.dtype(out_dtype).itemsize
    while bm > 64 and 2 * bm * Cv * (n_in_bytes + out_b) > _VMEM_BUDGET:
        bm = _round_up(bm // 2, 8)
    if _cdiv(Mv, bm) == 1 and Mv > 8:          # v7x megacore: >= 2 row blocks
        bm = _round_up(_cdiv(Mv, 2), 8)
    Mp = _round_up(Mv, bm)

    def _pad_rows(t):
        return jnp.pad(t, ((0, Mp - Mv), (0, 0))) if Mp != Mv else t

    args = [_pad_rows(zv), sv, tv]
    in_specs = [pl.BlockSpec((bm, Cv), lambda i: (i, 0)),
                pl.BlockSpec((1, Cv), lambda i: (0, 0)),
                pl.BlockSpec((1, Cv), lambda i: (0, 0))]
    kernel = _bn_relu_kernel
    if rv is not None:
        args.append(_pad_rows(rv))
        in_specs.append(pl.BlockSpec((bm, Cv), lambda i: (i, 0)))
        kernel = _bn_add_relu_kernel

    out = pl.pallas_call(
        kernel,
        out_shape=jax.ShapeDtypeStruct((Mp, Cv), out_dtype),
        grid_spec=pltpu.PrefetchScalarGridSpec(
            num_scalar_prefetch=0,
            grid=(Mp // bm,),
            in_specs=in_specs,
            out_specs=pl.BlockSpec((bm, Cv), lambda i: (i, 0)),
        ),
        compiler_params=pltpu.CompilerParams(
            dimension_semantics=("parallel",),
            vmem_limit_bytes=32 * 1024 * 1024),
    )(*args)

    out = out[:Mv] if Mp != Mv else out
    return out.reshape(M, C) if repack else out


def batchnorm_relu(z, col_sum, col_sq, gamma, beta, residual=None, *,
                   out_dtype=jnp.float32):
    """Train-mode BatchNorm2d (batch statistics, as a fresh PyTorch module uses)
    followed by ReLU; optionally fuses the residual add before the ReLU.
    The batch statistics arrive fused from the conv matmul epilogue."""
    Nb, H, W, C = z.shape
    n = float(Nb * H * W)
    mean = col_sum / n
    var = jnp.maximum(col_sq / n - mean * mean, 0.0)   # biased var (PyTorch)
    scale = gamma * lax.rsqrt(var + BN_EPS)
    shift = beta - mean * scale
    rf = residual.reshape(-1, C) if residual is not None else None
    out = _scale_shift_relu(z.reshape(-1, C), scale, shift, rf,
                            out_dtype=out_dtype)
    return out.reshape(Nb, H, W, C)


# ---------------------------------------------------------------------------
# Conv2d = im2col (bf16, fused under jit) + Pallas matmul with fused bias+stats.
# ---------------------------------------------------------------------------
def _extract_patches(x, kh, kw, stride, pad):
    """im2col on an NHWC tensor with zero padding (matches nn.Conv2d)."""
    if pad:
        x = jnp.pad(x, ((0, 0), (pad, pad), (pad, pad), (0, 0)))
    _, Hp, Wp, _ = x.shape
    Ho = (Hp - kh) // stride + 1
    Wo = (Wp - kw) // stride + 1
    pieces = []
    for i in range(kh):
        for j in range(kw):
            pieces.append(x[:, i:i + (Ho - 1) * stride + 1:stride,
                            j:j + (Wo - 1) * stride + 1:stride, :])
    return jnp.concatenate(pieces, axis=-1), Ho, Wo


def conv2d(x, w, b, stride, pad, *, out_dtype=jnp.bfloat16):
    """x: NHWC, w: (Cout, Cin, kh, kw) torch-style, b: (Cout,).
    Returns (y NHWC, per-channel column sum, per-channel sum-of-squares)."""
    cout, cin, kh, kw = w.shape
    # Cast to bf16 BEFORE im2col: halves the materialized patches footprint.
    patches, Ho, Wo = _extract_patches(x.astype(jnp.bfloat16), kh, kw, stride, pad)
    Nb = x.shape[0]
    a = patches.reshape(Nb * Ho * Wo, kh * kw * cin)
    wt = jnp.transpose(w, (2, 3, 1, 0)).reshape(kh * kw * cin, cout)
    out, col_sum, col_sq = matmul_bias(a, wt, b, out_dtype=out_dtype)
    return out.reshape(Nb, Ho, Wo, cout), col_sum, col_sq


# ---------------------------------------------------------------------------
# Parameter init (deterministic, torch-like uniform fan-in bounds).
# ---------------------------------------------------------------------------
def _conv_init(key, cin, cout, k):
    kw_, kb_ = jax.random.split(key)
    bound = 1.0 / (cin * k * k) ** 0.5
    w = jax.random.uniform(kw_, (cout, cin, k, k), jnp.float32, -bound, bound)
    b = jax.random.uniform(kb_, (cout,), jnp.float32, -bound, bound)
    return w, b


def init_resblock(key, in_channels, out_channels):
    k1, k2, k3 = jax.random.split(key, 3)
    params = {
        "conv1": _conv_init(k1, in_channels, out_channels, 3),
        "bn1": (jnp.ones((out_channels,), jnp.float32),
                jnp.zeros((out_channels,), jnp.float32)),
        "conv2": _conv_init(k2, out_channels, out_channels, 3),
        "bn2": (jnp.ones((out_channels,), jnp.float32),
                jnp.zeros((out_channels,), jnp.float32)),
    }
    if in_channels != out_channels:
        params["conv11"] = _conv_init(k3, in_channels, out_channels, 1)
    return params


# ---------------------------------------------------------------------------
# ResBlock forward (mirrors the PyTorch module).
# ---------------------------------------------------------------------------
def resblock_apply_nhwc(params, x, *, stride=1, out_dtype=jnp.float32):
    """ResBlock forward on an NHWC tensor (keep NHWC between stacked blocks)."""
    # residual branch: Conv3x3(stride) -> BN -> ReLU -> Conv3x3 -> BN
    z1, s1, q1 = conv2d(x, *params["conv1"], stride=stride, pad=1)
    a1 = batchnorm_relu(z1, s1, q1, *params["bn1"], out_dtype=jnp.bfloat16)
    z2, s2, q2 = conv2d(a1, *params["conv2"], stride=1, pad=1)

    # shortcut: 1x1 projection when channel counts differ, else identity
    # (identity + stride>1 shape-mismatches, exactly like the PyTorch module).
    if "conv11" in params:
        sc, _, _ = conv2d(x, *params["conv11"], stride=stride, pad=0)
    else:
        sc = x.astype(jnp.bfloat16)

    # BN2 + residual add + final ReLU, fused in one Pallas pass.
    return batchnorm_relu(z2, s2, q2, *params["bn2"], residual=sc,
                          out_dtype=out_dtype)


@functools.partial(jax.jit, static_argnames=("stride",))
def resblock_apply(params, x_nchw, *, stride=1):
    """NCHW wrapper matching the PyTorch module's interface."""
    x = jnp.transpose(x_nchw, (0, 2, 3, 1)).astype(jnp.float32)  # NCHW -> NHWC
    y = resblock_apply_nhwc(params, x, stride=stride)
    return jnp.transpose(y, (0, 3, 1, 2))                        # NHWC -> NCHW


if __name__ == "__main__":
    key = jax.random.PRNGKey(0)
    kp1, kp2, kp3, kx = jax.random.split(key, 4)

    # Block 1: channel change + stride 2 -> exercises the 1x1 projection
    # shortcut and the strided conv path.
    in_ch, out_ch, stride = 64, 128, 2
    params1 = init_resblock(kp1, in_ch, out_ch)
    x = jax.random.normal(kx, (2, in_ch, 16, 16), dtype=jnp.float32)
    y1 = jax.block_until_ready(resblock_apply(params1, x, stride=stride))
    assert y1.shape == (2, out_ch, 8, 8), y1.shape

    # Blocks 1+2 stacked with NHWC (and bf16) kept in between — transposes
    # hoisted to the model boundary; block 2 uses the identity shortcut.
    params2 = init_resblock(kp2, out_ch, out_ch)

    @jax.jit
    def two_blocks(p1, p2, x_nchw):
        h = jnp.transpose(x_nchw, (0, 2, 3, 1)).astype(jnp.float32)
        h = resblock_apply_nhwc(p1, h, stride=2, out_dtype=jnp.bfloat16)
        h = resblock_apply_nhwc(p2, h, stride=1, out_dtype=jnp.float32)
        return jnp.transpose(h, (0, 3, 1, 2))

    y2 = jax.block_until_ready(two_blocks(params1, params2, x))
    assert y2.shape == (2, out_ch, 8, 8), y2.shape

    # Block 3: small channel count (C=32 < 128) -> exercises the lane-dense
    # repack path of the fused BN/ReLU kernel and the identity shortcut.
    params3 = init_resblock(kp3, 32, 32)
    x3 = jax.random.normal(kx, (2, 32, 16, 16), dtype=jnp.float32)
    y3 = jax.block_until_ready(resblock_apply(params3, x3, stride=1))
    assert y3.shape == (2, 32, 16, 16), y3.shape

    for y in (y1, y2, y3):
        assert bool(jnp.all(jnp.isfinite(y)))
        assert bool(jnp.all(y >= 0))          # final ReLU
    print("KERNEL_OK")
</pallas_src>

<mosaic_0001>
module attributes {stable_mosaic.version = 11 : i64} {
  func.func @_mm_bias_stats_kernel(%arg0: i32, %arg1: i32, %arg2: memref<64x128xbf16, #tpu.memory_space<vmem>>, %arg3: memref<128x128xbf16, #tpu.memory_space<vmem>>, %arg4: memref<1x128xf32, #tpu.memory_space<vmem>>, %arg5: memref<64x128xbf16, #tpu.memory_space<vmem>>, %arg6: memref<1x1x128xf32, #tpu.memory_space<vmem>>, %arg7: memref<1x1x128xf32, #tpu.memory_space<vmem>>) attributes {dimension_semantics = [#tpu.dimension_semantics<parallel>, #tpu.dimension_semantics<parallel>], iteration_bounds = array<i64: 2, 1>, scalar_prefetch = 0 : i64, scratch_operands = 0 : i64, tpu.core_type = #tpu.core_type<tc>, window_params = [{transform_indices = @transform_0, window_bounds = array<i64: 64, 128>}, {transform_indices = @transform_1, window_bounds = array<i64: 128, 128>}, {transform_indices = @transform_2, window_bounds = array<i64: 1, 128>}, {transform_indices = @transform_3, window_bounds = array<i64: 64, 128>}, {transform_indices = @transform_4, window_bounds = array<i64: 1, 1, 128>}, {transform_indices = @transform_5, window_bounds = array<i64: 1, 1, 128>}]} {
    %c0 = arith.constant 0 : index
    %c0_0 = arith.constant 0 : index
    %0 = vector.load %arg2[%c0, %c0_0] : memref<64x128xbf16, #tpu.memory_space<vmem>>, vector<64x128xbf16>
    %c0_1 = arith.constant 0 : index
    %c0_2 = arith.constant 0 : index
    %1 = vector.load %arg3[%c0_1, %c0_2] : memref<128x128xbf16, #tpu.memory_space<vmem>>, vector<128x128xbf16>
    %cst = arith.constant dense<0.000000e+00> : vector<64x128xf32>
    %2 = tpu.matmul %0, %1, %cst {dimension_numbers = #tpu.dot_dimension_numbers<[1], [0], [0], [1], [0, 0, 1, 1], [], []>} : vector<64x128xbf16>, vector<128x128xbf16>, vector<64x128xf32> -> vector<64x128xf32>
    %c0_3 = arith.constant 0 : index
    %c0_4 = arith.constant 0 : index
    %3 = vector.load %arg4[%c0_3, %c0_4] : memref<1x128xf32, #tpu.memory_space<vmem>>, vector<1x128xf32>
    %4 = vector.broadcast %3 : vector<1x128xf32> to vector<64x128xf32>
    %5 = arith.addf %2, %4 : vector<64x128xf32>
    %6 = arith.truncf %5 : vector<64x128xf32> to vector<64x128xbf16>
    %c0_5 = arith.constant 0 : index
    %c0_6 = arith.constant 0 : index
    %7 = vector.load %arg5[%c0_5, %c0_6] : memref<64x128xbf16, #tpu.memory_space<vmem>>, vector<64x128xbf16>
    tpu.vector_store %arg5[%c0_5, %c0_6], %6 {strides = array<i32>} : memref<64x128xbf16, #tpu.memory_space<vmem>>, vector<64x128xbf16>,
    %cst_7 = arith.constant dense<0.000000e+00> : vector<128xf32>
    %8 = vector.multi_reduction <add>, %5, %cst_7 [0] : vector<64x128xf32> to vector<128xf32>
    %9 = vector.shape_cast %8 : vector<128xf32> to vector<1x128xf32>
    %10 = vector.shape_cast %9 : vector<1x128xf32> to vector<1x1x128xf32>
    %c0_8 = arith.constant 0 : index
    %c0_9 = arith.constant 0 : index
    %c0_10 = arith.constant 0 : index
    %11 = vector.load %arg6[%c0_8, %c0_9, %c0_10] : memref<1x1x128xf32, #tpu.memory_space<vmem>>, vector<1x1x128xf32>
    tpu.vector_store %arg6[%c0_8, %c0_9, %c0_10], %10 {strides = array<i32>} : memref<1x1x128xf32, #tpu.memory_space<vmem>>, vector<1x1x128xf32>,
    %12 = arith.mulf %5, %5 : vector<64x128xf32>
    %cst_11 = arith.constant dense<0.000000e+00> : vector<128xf32>
    %13 = vector.multi_reduction <add>, %12, %cst_11 [0] : vector<64x128xf32> to vector<128xf32>
    %14 = vector.shape_cast %13 : vector<128xf32> to vector<1x128xf32>
    %15 = vector.shape_cast %14 : vector<1x128xf32> to vector<1x1x128xf32>
    %c0_12 = arith.constant 0 : index
    %c0_13 = arith.constant 0 : index
    %c0_14 = arith.constant 0 : index
    %16 = vector.load %arg7[%c0_12, %c0_13, %c0_14] : memref<1x1x128xf32, #tpu.memory_space<vmem>>, vector<1x1x128xf32>
    tpu.vector_store %arg7[%c0_12, %c0_13, %c0_14], %15 {strides = array<i32>} : memref<1x1x128xf32, #tpu.memory_space<vmem>>, vector<1x1x128xf32>,
    return
  }
  func.func @transform_0(%arg0: i32, %arg1: i32) -> (i32, i32) {
    %c0_i32 = arith.constant 0 : i32
    %c0_i32_0 = arith.constant 0 : i32
    return %arg0, %c0_i32 : i32, i32
  }
  func.func @transform_1(%arg0: i32, %arg1: i32) -> (i32, i32) {
    %c0_i32 = arith.constant 0 : i32
    %c0_i32_0 = arith.constant 0 : i32
    return %c0_i32, %arg1 : i32, i32
  }
  func.func @transform_2(%arg0: i32, %arg1: i32) -> (i32, i32) {
    %c0_i32 = arith.constant 0 : i32
    %c0_i32_0 = arith.constant 0 : i32
    return %c0_i32, %arg1 : i32, i32
  }
  func.func @transform_3(%arg0: i32, %arg1: i32) -> (i32, i32) {
    %c0_i32 = arith.constant 0 : i32
    return %arg0, %arg1 : i32, i32
  }
  func.func @transform_4(%arg0: i32, %arg1: i32) -> (i32, i32, i32) {
    %c0_i32 = arith.constant 0 : i32
    %c0_i32_0 = arith.constant 0 : i32
    return %arg0, %c0_i32, %arg1 : i32, i32, i32
  }
  func.func @transform_5(%arg0: i32, %arg1: i32) -> (i32, i32, i32) {
    %c0_i32 = arith.constant 0 : i32
    %c0_i32_0 = arith.constant 0 : i32
    return %arg0, %c0_i32, %arg1 : i32, i32, i32
  }
}

module attributes {stable_mosaic.version = 11 : i64} {
  func.func @_mm_bias_stats_kernel(%arg0: i32, %arg1: i32, %arg2: memref<64x640xbf16, #tpu.memory_space<vmem>>, %arg3: memref<640x128xbf16, #tpu.memory_space<vmem>>, %arg4: memref<1x128xf32, #tpu.memory_space<vmem>>, %arg5: memref<64x128xbf16, #tpu.memory_space<vmem>>, %arg6: memref<1x1x128xf32, #tpu.memory_space<vmem>>, %arg7: memref<1x1x128xf32, #tpu.memory_space<vmem>>) attributes {dimension_semantics = [#tpu.dimension_semantics<parallel>, #tpu.dimension_semantics<parallel>], iteration_bounds = array<i64: 2, 1>, scalar_prefetch = 0 : i64, scratch_operands = 0 : i64, tpu.core_type = #tpu.core_type<tc>, window_params = [{transform_indices = @transform_0, window_bounds = array<i64: 64, 640>}, {transform_indices = @transform_1, window_bounds = array<i64: 640, 128>}, {transform_indices = @transform_2, window_bounds = array<i64: 1, 128>}, {transform_indices = @transform_3, window_bounds = array<i64: 64, 128>}, {transform_indices = @transform_4, window_bounds = array<i64: 1, 1, 128>}, {transform_indices = @transform_5, window_bounds = array<i64: 1, 1, 128>}]} {
    %c0 = arith.constant 0 : index
    %c0_0 = arith.constant 0 : index
    %0 = vector.load %arg2[%c0, %c0_0] : memref<64x640xbf16, #tpu.memory_space<vmem>>, vector<64x640xbf16>
    %c0_1 = arith.constant 0 : index
    %c0_2 = arith.constant 0 : index
    %1 = vector.load %arg3[%c0_1, %c0_2] : memref<640x128xbf16, #tpu.memory_space<vmem>>, vector<640x128xbf16>
    %cst = arith.constant dense<0.000000e+00> : vector<64x128xf32>
    %2 = tpu.matmul %0, %1, %cst {dimension_numbers = #tpu.dot_dimension_numbers<[1], [0], [0], [1], [0, 0, 1, 1], [], []>} : vector<64x640xbf16>, vector<640x128xbf16>, vector<64x128xf32> -> vector<64x128xf32>
    %c0_3 = arith.constant 0 : index
    %c0_4 = arith.constant 0 : index
    %3 = vector.load %arg4[%c0_3, %c0_4] : memref<1x128xf32, #tpu.memory_space<vmem>>, vector<1x128xf32>
    %4 = vector.broadcast %3 : vector<1x128xf32> to vector<64x128xf32>
    %5 = arith.addf %2, %4 : vector<64x128xf32>
    %6 = arith.truncf %5 : vector<64x128xf32> to vector<64x128xbf16>
    %c0_5 = arith.constant 0 : index
    %c0_6 = arith.constant 0 : index
    %7 = vector.load %arg5[%c0_5, %c0_6] : memref<64x128xbf16, #tpu.memory_space<vmem>>, vector<64x128xbf16>
    tpu.vector_store %arg5[%c0_5, %c0_6], %6 {strides = array<i32>} : memref<64x128xbf16, #tpu.memory_space<vmem>>, vector<64x128xbf16>,
    %cst_7 = arith.constant dense<0.000000e+00> : vector<128xf32>
    %8 = vector.multi_reduction <add>, %5, %cst_7 [0] : vector<64x128xf32> to vector<128xf32>
    %9 = vector.shape_cast %8 : vector<128xf32> to vector<1x128xf32>
    %10 = vector.shape_cast %9 : vector<1x128xf32> to vector<1x1x128xf32>
    %c0_8 = arith.constant 0 : index
    %c0_9 = arith.constant 0 : index
    %c0_10 = arith.constant 0 : index
    %11 = vector.load %arg6[%c0_8, %c0_9, %c0_10] : memref<1x1x128xf32, #tpu.memory_space<vmem>>, vector<1x1x128xf32>
    tpu.vector_store %arg6[%c0_8, %c0_9, %c0_10], %10 {strides = array<i32>} : memref<1x1x128xf32, #tpu.memory_space<vmem>>, vector<1x1x128xf32>,
    %12 = arith.mulf %5, %5 : vector<64x128xf32>
    %cst_11 = arith.constant dense<0.000000e+00> : vector<128xf32>
    %13 = vector.multi_reduction <add>, %12, %cst_11 [0] : vector<64x128xf32> to vector<128xf32>
    %14 = vector.shape_cast %13 : vector<128xf32> to vector<1x128xf32>
    %15 = vector.shape_cast %14 : vector<1x128xf32> to vector<1x1x128xf32>
    %c0_12 = arith.constant 0 : index
    %c0_13 = arith.constant 0 : index
    %c0_14 = arith.constant 0 : index
    %16 = vector.load %arg7[%c0_12, %c0_13, %c0_14] : memref<1x1x128xf32, #tpu.memory_space<vmem>>, vector<1x1x128xf32>
    tpu.vector_store %arg7[%c0_12, %c0_13, %c0_14], %15 {strides = array<i32>} : memref<1x1x128xf32, #tpu.memory_space<vmem>>, vector<1x1x128xf32>,
    return
  }
  func.func @transform_0(%arg0: i32, %arg1: i32) -> (i32, i32) {
    %c0_i32 = arith.constant 0 : i32
    %c0_i32_0 = arith.constant 0 : i32
    return %arg0, %c0_i32 : i32, i32
  }
  func.func @transform_1(%arg0: i32, %arg1: i32) -> (i32, i32) {
    %c0_i32 = arith.constant 0 : i32
    %c0_i32_0 = arith.constant 0 : i32
    return %c0_i32, %arg1 : i32, i32
  }
  func.func @transform_2(%arg0: i32, %arg1: i32) -> (i32, i32) {
    %c0_i32 = arith.constant 0 : i32
    %c0_i32_0 = arith.constant 0 : i32
    return %c0_i32, %arg1 : i32, i32
  }
  func.func @transform_3(%arg0: i32, %arg1: i32) -> (i32, i32) {
    %c0_i32 = arith.constant 0 : i32
    return %arg0, %arg1 : i32, i32
  }
  func.func @transform_4(%arg0: i32, %arg1: i32) -> (i32, i32, i32) {
    %c0_i32 = arith.constant 0 : i32
    %c0_i32_0 = arith.constant 0 : i32
    return %arg0, %c0_i32, %arg1 : i32, i32, i32
  }
  func.func @transform_5(%arg0: i32, %arg1: i32) -> (i32, i32, i32) {
    %c0_i32 = arith.constant 0 : i32
    %c0_i32_0 = arith.constant 0 : i32
    return %arg0, %c0_i32, %arg1 : i32, i32, i32
  }
}

module attributes {stable_mosaic.version = 11 : i64} {
  func.func @_bn_relu_kernel(%arg0: i32, %arg1: memref<64x128xbf16, #tpu.memory_space<vmem>>, %arg2: memref<1x128xf32, #tpu.memory_space<vmem>>, %arg3: memref<1x128xf32, #tpu.memory_space<vmem>>, %arg4: memref<64x128xbf16, #tpu.memory_space<vmem>>) attributes {dimension_semantics = [#tpu.dimension_semantics<parallel>], iteration_bounds = array<i64: 2>, scalar_prefetch = 0 : i64, scratch_operands = 0 : i64, tpu.core_type = #tpu.core_type<tc>, window_params = [{transform_indices = @transform_0, window_bounds = array<i64: 64, 128>}, {pipeline_mode = #tpu.pipeline_mode<synchronous>, transform_indices = @transform_1, window_bounds = array<i64: 1, 128>}, {pipeline_mode = #tpu.pipeline_mode<synchronous>, transform_indices = @transform_2, window_bounds = array<i64: 1, 128>}, {transform_indices = @transform_3, window_bounds = array<i64: 64, 128>}]} {
    %c0 = arith.constant 0 : index
    %c0_0 = arith.constant 0 : index
    %0 = vector.load %arg1[%c0, %c0_0] : memref<64x128xbf16, #tpu.memory_space<vmem>>, vector<64x128xbf16>
    %1 = arith.extf %0 : vector<64x128xbf16> to vector<64x128xf32>
    %c0_1 = arith.constant 0 : index
    %c0_2 = arith.constant 0 : index
    %2 = vector.load %arg2[%c0_1, %c0_2] : memref<1x128xf32, #tpu.memory_space<vmem>>, vector<1x128xf32>
    %3 = vector.broadcast %2 : vector<1x128xf32> to vector<64x128xf32>
    %4 = arith.mulf %1, %3 : vector<64x128xf32>
    %c0_3 = arith.constant 0 : index
    %c0_4 = arith.constant 0 : index
    %5 = vector.load %arg3[%c0_3, %c0_4] : memref<1x128xf32, #tpu.memory_space<vmem>>, vector<1x128xf32>
    %6 = vector.broadcast %5 : vector<1x128xf32> to vector<64x128xf32>
    %7 = arith.addf %4, %6 : vector<64x128xf32>
    %cst = arith.constant 0.000000e+00 : f32
    %8 = vector.broadcast %cst : f32 to vector<64x128xf32>
    %9 = arith.maximumf %7, %8 : vector<64x128xf32>
    %10 = arith.truncf %9 : vector<64x128xf32> to vector<64x128xbf16>
    %c0_5 = arith.constant 0 : index
    %c0_6 = arith.constant 0 : index
    %11 = vector.load %arg4[%c0_5, %c0_6] : memref<64x128xbf16, #tpu.memory_space<vmem>>, vector<64x128xbf16>
    tpu.vector_store %arg4[%c0_5, %c0_6], %10 {strides = array<i32>} : memref<64x128xbf16, #tpu.memory_space<vmem>>, vector<64x128xbf16>,
    return
  }
  func.func @transform_0(%arg0: i32) -> (i32, i32) {
    %c0_i32 = arith.constant 0 : i32
    %c0_i32_0 = arith.constant 0 : i32
    return %arg0, %c0_i32 : i32, i32
  }
  func.func @transform_1(%arg0: i32) -> (i32, i32) {
    %c0_i32 = arith.constant 0 : i32
    %c0_i32_0 = arith.constant 0 : i32
    %c0_i32_1 = arith.constant 0 : i32
    return %c0_i32, %c0_i32_0 : i32, i32
  }
  func.func @transform_2(%arg0: i32) -> (i32, i32) {
    %c0_i32 = arith.constant 0 : i32
    %c0_i32_0 = arith.constant 0 : i32
    %c0_i32_1 = arith.constant 0 : i32
    return %c0_i32, %c0_i32_0 : i32, i32
  }
  func.func @transform_3(%arg0: i32) -> (i32, i32) {
    %c0_i32 = arith.constant 0 : i32
    %c0_i32_0 = arith.constant 0 : i32
    return %arg0, %c0_i32 : i32, i32
  }
}

module attributes {stable_mosaic.version = 11 : i64} {
  func.func @_bn_add_relu_kernel(%arg0: i32, %arg1: memref<64x128xbf16, #tpu.memory_space<vmem>>, %arg2: memref<1x128xf32, #tpu.memory_space<vmem>>, %arg3: memref<1x128xf32, #tpu.memory_space<vmem>>, %arg4: memref<64x128xbf16, #tpu.memory_space<vmem>>, %arg5: memref<64x128xf32, #tpu.memory_space<vmem>>) attributes {dimension_semantics = [#tpu.dimension_semantics<parallel>], iteration_bounds = array<i64: 2>, scalar_prefetch = 0 : i64, scratch_operands = 0 : i64, tpu.core_type = #tpu.core_type<tc>, window_params = [{transform_indices = @transform_0, window_bounds = array<i64: 64, 128>}, {pipeline_mode = #tpu.pipeline_mode<synchronous>, transform_indices = @transform_1, window_bounds = array<i64: 1, 128>}, {pipeline_mode = #tpu.pipeline_mode<synchronous>, transform_indices = @transform_2, window_bounds = array<i64: 1, 128>}, {transform_indices = @transform_3, window_bounds = array<i64: 64, 128>}, {transform_indices = @transform_4, window_bounds = array<i64: 64, 128>}]} {
    %c0 = arith.constant 0 : index
    %c0_0 = arith.constant 0 : index
    %0 = vector.load %arg1[%c0, %c0_0] : memref<64x128xbf16, #tpu.memory_space<vmem>>, vector<64x128xbf16>
    %1 = arith.extf %0 : vector<64x128xbf16> to vector<64x128xf32>
    %c0_1 = arith.constant 0 : index
    %c0_2 = arith.constant 0 : index
    %2 = vector.load %arg4[%c0_1, %c0_2] : memref<64x128xbf16, #tpu.memory_space<vmem>>, vector<64x128xbf16>
    %3 = arith.extf %2 : vector<64x128xbf16> to vector<64x128xf32>
    %c0_3 = arith.constant 0 : index
    %c0_4 = arith.constant 0 : index
    %4 = vector.load %arg2[%c0_3, %c0_4] : memref<1x128xf32, #tpu.memory_space<vmem>>, vector<1x128xf32>
    %5 = vector.broadcast %4 : vector<1x128xf32> to vector<64x128xf32>
    %6 = arith.mulf %1, %5 : vector<64x128xf32>
    %c0_5 = arith.constant 0 : index
    %c0_6 = arith.constant 0 : index
    %7 = vector.load %arg3[%c0_5, %c0_6] : memref<1x128xf32, #tpu.memory_space<vmem>>, vector<1x128xf32>
    %8 = vector.broadcast %7 : vector<1x128xf32> to vector<64x128xf32>
    %9 = arith.addf %6, %8 : vector<64x128xf32>
    %10 = arith.addf %9, %3 : vector<64x128xf32>
    %cst = arith.constant 0.000000e+00 : f32
    %11 = vector.broadcast %cst : f32 to vector<64x128xf32>
    %12 = arith.maximumf %10, %11 : vector<64x128xf32>
    %c0_7 = arith.constant 0 : index
    %c0_8 = arith.constant 0 : index
    %13 = vector.load %arg5[%c0_7, %c0_8] : memref<64x128xf32, #tpu.memory_space<vmem>>, vector<64x128xf32>
    tpu.vector_store %arg5[%c0_7, %c0_8], %12 {strides = array<i32>} : memref<64x128xf32, #tpu.memory_space<vmem>>, vector<64x128xf32>,
    return
  }
  func.func @transform_0(%arg0: i32) -> (i32, i32) {
    %c0_i32 = arith.constant 0 : i32
    %c0_i32_0 = arith.constant 0 : i32
    return %arg0, %c0_i32 : i32, i32
  }
  func.func @transform_1(%arg0: i32) -> (i32, i32) {
    %c0_i32 = arith.constant 0 : i32
    %c0_i32_0 = arith.constant 0 : i32
    %c0_i32_1 = arith.constant 0 : i32
    return %c0_i32, %c0_i32_0 : i32, i32
  }
  func.func @transform_2(%arg0: i32) -> (i32, i32) {
    %c0_i32 = arith.constant 0 : i32
    %c0_i32_0 = arith.constant 0 : i32
    %c0_i32_1 = arith.constant 0 : i32
    return %c0_i32, %c0_i32_0 : i32, i32
  }
  func.func @transform_3(%arg0: i32) -> (i32, i32) {
    %c0_i32 = arith.constant 0 : i32
    %c0_i32_0 = arith.constant 0 : i32
    return %arg0, %c0_i32 : i32, i32
  }
  func.func @transform_4(%arg0: i32) -> (i32, i32) {
    %c0_i32 = arith.constant 0 : i32
    %c0_i32_0 = arith.constant 0 : i32
    return %arg0, %c0_i32 : i32, i32
  }
}

module attributes {stable_mosaic.version = 11 : i64} {
  func.func @_mm_bias_stats_kernel(%arg0: i32, %arg1: i32, %arg2: memref<64x1152xbf16, #tpu.memory_space<vmem>>, %arg3: memref<1152x128xbf16, #tpu.memory_space<vmem>>, %arg4: memref<1x128xf32, #tpu.memory_space<vmem>>, %arg5: memref<64x128xbf16, #tpu.memory_space<vmem>>, %arg6: memref<1x1x128xf32, #tpu.memory_space<vmem>>, %arg7: memref<1x1x128xf32, #tpu.memory_space<vmem>>) attributes {dimension_semantics = [#tpu.dimension_semantics<parallel>, #tpu.dimension_semantics<parallel>], iteration_bounds = array<i64: 2, 1>, scalar_prefetch = 0 : i64, scratch_operands = 0 : i64, tpu.core_type = #tpu.core_type<tc>, window_params = [{transform_indices = @transform_0, window_bounds = array<i64: 64, 1152>}, {transform_indices = @transform_1, window_bounds = array<i64: 1152, 128>}, {transform_indices = @transform_2, window_bounds = array<i64: 1, 128>}, {transform_indices = @transform_3, window_bounds = array<i64: 64, 128>}, {transform_indices = @transform_4, window_bounds = array<i64: 1, 1, 128>}, {transform_indices = @transform_5, window_bounds = array<i64: 1, 1, 128>}]} {
    %c0 = arith.constant 0 : index
    %c0_0 = arith.constant 0 : index
    %0 = vector.load %arg2[%c0, %c0_0] : memref<64x1152xbf16, #tpu.memory_space<vmem>>, vector<64x1152xbf16>
    %c0_1 = arith.constant 0 : index
    %c0_2 = arith.constant 0 : index
    %1 = vector.load %arg3[%c0_1, %c0_2] : memref<1152x128xbf16, #tpu.memory_space<vmem>>, vector<1152x128xbf16>
    %cst = arith.constant dense<0.000000e+00> : vector<64x128xf32>
    %2 = tpu.matmul %0, %1, %cst {dimension_numbers = #tpu.dot_dimension_numbers<[1], [0], [0], [1], [0, 0, 1, 1], [], []>} : vector<64x1152xbf16>, vector<1152x128xbf16>, vector<64x128xf32> -> vector<64x128xf32>
    %c0_3 = arith.constant 0 : index
    %c0_4 = arith.constant 0 : index
    %3 = vector.load %arg4[%c0_3, %c0_4] : memref<1x128xf32, #tpu.memory_space<vmem>>, vector<1x128xf32>
    %4 = vector.broadcast %3 : vector<1x128xf32> to vector<64x128xf32>
    %5 = arith.addf %2, %4 : vector<64x128xf32>
    %6 = arith.truncf %5 : vector<64x128xf32> to vector<64x128xbf16>
    %c0_5 = arith.constant 0 : index
    %c0_6 = arith.constant 0 : index
    %7 = vector.load %arg5[%c0_5, %c0_6] : memref<64x128xbf16, #tpu.memory_space<vmem>>, vector<64x128xbf16>
    tpu.vector_store %arg5[%c0_5, %c0_6], %6 {strides = array<i32>} : memref<64x128xbf16, #tpu.memory_space<vmem>>, vector<64x128xbf16>,
    %cst_7 = arith.constant dense<0.000000e+00> : vector<128xf32>
    %8 = vector.multi_reduction <add>, %5, %cst_7 [0] : vector<64x128xf32> to vector<128xf32>
    %9 = vector.shape_cast %8 : vector<128xf32> to vector<1x128xf32>
    %10 = vector.shape_cast %9 : vector<1x128xf32> to vector<1x1x128xf32>
    %c0_8 = arith.constant 0 : index
    %c0_9 = arith.constant 0 : index
    %c0_10 = arith.constant 0 : index
    %11 = vector.load %arg6[%c0_8, %c0_9, %c0_10] : memref<1x1x128xf32, #tpu.memory_space<vmem>>, vector<1x1x128xf32>
    tpu.vector_store %arg6[%c0_8, %c0_9, %c0_10], %10 {strides = array<i32>} : memref<1x1x128xf32, #tpu.memory_space<vmem>>, vector<1x1x128xf32>,
    %12 = arith.mulf %5, %5 : vector<64x128xf32>
    %cst_11 = arith.constant dense<0.000000e+00> : vector<128xf32>
    %13 = vector.multi_reduction <add>, %12, %cst_11 [0] : vector<64x128xf32> to vector<128xf32>
    %14 = vector.shape_cast %13 : vector<128xf32> to vector<1x128xf32>
    %15 = vector.shape_cast %14 : vector<1x128xf32> to vector<1x1x128xf32>
    %c0_12 = arith.constant 0 : index
    %c0_13 = arith.constant 0 : index
    %c0_14 = arith.constant 0 : index
    %16 = vector.load %arg7[%c0_12, %c0_13, %c0_14] : memref<1x1x128xf32, #tpu.memory_space<vmem>>, vector<1x1x128xf32>
    tpu.vector_store %arg7[%c0_12, %c0_13, %c0_14], %15 {strides = array<i32>} : memref<1x1x128xf32, #tpu.memory_space<vmem>>, vector<1x1x128xf32>,
    return
  }
  func.func @transform_0(%arg0: i32, %arg1: i32) -> (i32, i32) {
    %c0_i32 = arith.constant 0 : i32
    %c0_i32_0 = arith.constant 0 : i32
    return %arg0, %c0_i32 : i32, i32
  }
  func.func @transform_1(%arg0: i32, %arg1: i32) -> (i32, i32) {
    %c0_i32 = arith.constant 0 : i32
    %c0_i32_0 = arith.constant 0 : i32
    return %c0_i32, %arg1 : i32, i32
  }
  func.func @transform_2(%arg0: i32, %arg1: i32) -> (i32, i32) {
    %c0_i32 = arith.constant 0 : i32
    %c0_i32_0 = arith.constant 0 : i32
    return %c0_i32, %arg1 : i32, i32
  }
  func.func @transform_3(%arg0: i32, %arg1: i32) -> (i32, i32) {
    %c0_i32 = arith.constant 0 : i32
    return %arg0, %arg1 : i32, i32
  }
  func.func @transform_4(%arg0: i32, %arg1: i32) -> (i32, i32, i32) {
    %c0_i32 = arith.constant 0 : i32
    %c0_i32_0 = arith.constant 0 : i32
    return %arg0, %c0_i32, %arg1 : i32, i32, i32
  }
  func.func @transform_5(%arg0: i32, %arg1: i32) -> (i32, i32, i32) {
    %c0_i32 = arith.constant 0 : i32
    %c0_i32_0 = arith.constant 0 : i32
    return %arg0, %c0_i32, %arg1 : i32, i32, i32
  }
}

</mosaic_0001>

<bundles_post_ra>
// kernel: resblock_apply.8
= control target key start
LH: loop header
LB: loop body
LE: loop exit
PB: predicated region body
PF: predicated region fallthrough
CT: control target
= control target key end

     0   :  { %11 = vsyncpa [#allocation3], 0  ;;  %s1173_s0 = inlined_call_operand.vmem [shape: bf16[128,128], index: 0, kind: input, shape index: {}]   ;;  %s1174_s1 = inlined_call_operand.vmem [shape: bf16[128,128], index: 1, kind: input, shape index: {}]   ;;  %s1175_s2 = inlined_call_operand.vmem [shape: f32[1,128], index: 2, kind: input, shape index: {}]   ;;  %s1176_s3 = inlined_call_operand.vmem [shape: bf16[128,128], index: 3, kind: output, shape index: {0}]   ;;  %s1177_s4 = inlined_call_operand.hbm [shape: f32[2,1,128], index: 4, kind: output, shape index: {1}]   ;;  %s1178_s5 = inlined_call_operand.hbm [shape: f32[2,1,128], index: 5, kind: output, shape index: {2}]  }
   0x1   :  { %13 = vsyncpa [#allocation3 + $0x1], 0 }
   0x2   :  { %14 = vsyncpa [#allocation5], 0 }
   0x3   :  { %16 = vsyncpa [#allocation5 + $0x1], 0  ;;  %s1002_s18 = smov 0   ;;  %s1004_s19 = smov 0  }
   0x4   :  { %s1006_s20 = smov 0   ;;  %s1008_s21 = smov 0  }
   0x5   :  { %s1010_s22 = smov 0   ;;  %s1012_s23 = smov 0  }
   0x6 LB: > { %s679_s24 = sadd.s32 4294967295, %s970_s23   ;;  %s680_s25 = sadd.s32 4294967294, %s970_s23   ;;  %s970_s23 = sphi %s1012_s23, %s22_s23   ;;  %s966_s22 = sphi %s1010_s22, %s1185_s22   ;;  %s962_s21 = sphi %s1008_s21, %s1184_s21   ;;  %s958_s20 = sphi %s1006_s20, %s1183_s20   ;;  %s954_s19 = sphi %s1004_s19, %s1182_s19   ;;  %s950_s18 = sphi %s1002_s18, %s1181_s18  }
   0x7   : > { %s34_s26 = sadd.s32 1, %s966_s22  ;;  %s149_s27 = sadd.s32 1, %s958_s20 }
   0x8   : > { %p36_p0 = scmp.ge.s32.totalorder %s34_s26, 2  ;;  %p159_p1 = scmp.ne.s32.totalorder %s958_s20, %s954_s19 }
   0x9   : > { %p160_p2 = scmp.eq.s32.totalorder %s679_s24, 1  ;;  %p165_p3 = scmp.ne.s32.totalorder %s954_s19, %s950_s18 }
   0xa   : > { %s1187_s26 = smov (%p36_p0, %s34_s26), 0  ;;  %p166_p5 = scmp.eq.s32.totalorder %s680_s25, 1 }
   0xb   : > { %p1042_p4 = por %p160_p2, %p159_p1  ;;  %s144_s29 = ssub.s32 %s966_s22, %s1187_s26 }
   0xc   : > { %p685_p6 = scmp.ge.s32.totalorder %s970_s23, 1  ;;  %p147_p7 = scmp.eq.s32.totalorder %s144_s29, 0 }
   0xd   : > { %p1049_p8 = por %p166_p5, %p165_p3  ;;  %p234_p9 = scmp.lt.s32.totalorder %s970_s23, 3 }
   0xe   : > { %s1055_s6 = scalar_select %p147_p7, %s958_s20, %s149_s27  }
   0xf   : > { %p235_p10 = pnand %p685_p6, %p234_p9 }
  0x10   : > { %s686_s15 = sshll.u32 (!%p235_p10), %s962_s21, 3  ;;  %s509_s29 = scalar_lea.hbm (!%p235_p10), %s1177_s4, %s962_s21 }
  0x11   : > { %238 = sbr.rel (%p235_p10) target bundleno = 231 (0xe7), region = 32  ;;  %p281_p11 = scmp.lt.s32.totalorder (!%p235_p10), %s686_s15, 15 }
  0x12   : > { %s523_s9 = scalar_lea.hbm (!%p235_p10), %s1178_s5, %s962_s21 }
  0x13   : > { %s1117_s16 = sshll.u32 (!%p235_p10), %s523_s9, 4  ;;  %s528_s16 = int_to_ptr.hbm [resolvable:$true] %s1117_s16 }
  0x16   : > { %v751_v0 = vld [vmem:[%s1174_s1 + $0x38] sm:$0xff]  ;;  %v750_v1 = vld [vmem:[%s1174_s1 + $0x30] sm:$0xff]  ;;  %v749_v2 = vld [vmem:[%s1174_s1 + $0x28] sm:$0xff]  ;;  %s1189_s15 = smov (!%p281_p11, %s686_s15), 15 }
  0x17   : > { %402 = vmatpush.bf16.msra.mxu0 %v751_v0  ;;  %775 = vmatpush.bf16.msra.mxu1 %v751_v0  ;;  %v748_v3 = vld [vmem:[%s1174_s1 + $0x20] sm:$0xff]  ;;  %v747_v4 = vld [vmem:[%s1174_s1 + $0x18] sm:$0xff]  ;;  %v746_v5 = vld [vmem:[%s1174_s1 + $0x10] sm:$0xff]  ;;  %s687_s7 = sshll.u32 %s1189_s15, 2  ;;  %s1099_s15 = sand.u32 1, %s954_s19  }
  0x18   : > { %776 = vmatpush.bf16.msra.mxu2 %v751_v0  ;;  %777 = vmatpush.bf16.msra.mxu3 %v751_v0  ;;  %v745_v6 = vld [vmem:[%s1174_s1 + $0x8] sm:$0xff]  ;;  %v744_v7 = vld [vmem:[%s1174_s1] sm:$0xff]  ;;  %s284_s12 = scalar_lea.vmem %s1173_s0, %s687_s7  ;;  %s300_s24 = scalar_lea.vmem %s1176_s3, %s687_s7 }
  0x19   : > { %v740_v8 = vld [vmem:[%s284_s12] sm:$0xff]  ;;  %v741_v9 = vld [vmem:[%s284_s12 + $0x8] sm:$0xff]  ;;  %v742_v10 = vld [vmem:[%s284_s12 + $0x10] sm:$0xff]  ;;  %s273_s10 = scalar_lea.vmem [#allocation2], %s1099_s15  ;;  %s279_s13 = scalar_lea.vmem [#allocation4], %s1099_s15 }
  0x1a   : > { %v743_v11 = vld [vmem:[%s284_s12 + $0x18] sm:$0xff]  ;;  %v859_v14 = vld [vmem:[%s1175_s2] ss:$0 sm:$0xff]  ;;  %s1110_s11 = sshll.u32 %s273_s10, 4  ;;  %s1112_s12 = sshll.u32 %s509_s29, 4  ;;  %s512_s11 = int_to_ptr.vmem [resolvable:$true] %s1110_s11  ;;  %s514_s12 = int_to_ptr.hbm [resolvable:$true] %s1112_s12 }
  0x1b   : > { %403 = vmatpush.bf16.msra.mxu0 %v750_v1  ;;  %778 = vmatpush.bf16.msra.mxu1 %v750_v1  ;;  %s1115_s14 = sshll.u32 %s279_s13, 4  ;;  %s492_s21 = scalar_lea.sflag [#allocation3], %s1099_s15  ;;  %s526_s14 = int_to_ptr.vmem [resolvable:$true] %s1115_s14 }
  0x1c   : > { %779 = vmatpush.bf16.msra.mxu2 %v750_v1  ;;  %780 = vmatpush.bf16.msra.mxu3 %v750_v1  ;;  %s874_s17 = sshra.s32 %s514_s12, 4  ;;  %s880_s29 = scalar_lea.hbm %s1177_s4, 2  ;;  %s875_s17 = int_to_ptr.hbm [resolvable:$true] %s874_s17 }
  0x1d   : > { %p881_p1 = scmp.lt.s32.totalorder %s875_s17, %s1177_s4 }
  0x1f   : > { %404 = vmatpush.bf16.msra.mxu0 %v749_v2  ;;  %781 = vmatpush.bf16.msra.mxu1 %v749_v2 }
  0x20   : > { %782 = vmatpush.bf16.msra.mxu2 %v749_v2  ;;  %783 = vmatpush.bf16.msra.mxu3 %v749_v2 }
  0x23   : > { %405 = vmatpush.bf16.msra.mxu0 %v748_v3  ;;  %784 = vmatpush.bf16.msra.mxu1 %v748_v3 }
  0x24   : > { %785 = vmatpush.bf16.msra.mxu2 %v748_v3  ;;  %786 = vmatpush.bf16.msra.mxu3 %v748_v3 }
  0x27   : > { %406 = vmatpush.bf16.msra.mxu0 %v747_v4  ;;  %787 = vmatpush.bf16.msra.mxu1 %v747_v4 }
  0x28   : > { %788 = vmatpush.bf16.msra.mxu2 %v747_v4  ;;  %789 = vmatpush.bf16.msra.mxu3 %v747_v4 }
  0x2b   : > { %407 = vmatpush.bf16.msra.mxu0 %v746_v5  ;;  %790 = vmatpush.bf16.msra.mxu1 %v746_v5 }
  0x2c   : > { %791 = vmatpush.bf16.msra.mxu2 %v746_v5  ;;  %792 = vmatpush.bf16.msra.mxu3 %v746_v5 }
  0x2f   : > { %408 = vmatpush.bf16.msra.mxu0 %v745_v6  ;;  %793 = vmatpush.bf16.msra.mxu1 %v745_v6 }
  0x30   : > { %794 = vmatpush.bf16.msra.mxu2 %v745_v6  ;;  %795 = vmatpush.bf16.msra.mxu3 %v745_v6 }
  0x33   : > { %409 = vmatpush.bf16.msra.mxu0 %v744_v7  ;;  %796 = vmatpush.bf16.msra.mxu1 %v744_v7 }
  0x34   : > { %797 = vmatpush.bf16.msra.mxu2 %v744_v7  ;;  %798 = vmatpush.bf16.msra.mxu3 %v744_v7 }
  0x36   : > { %410 = vmatmul.bf16.vlgmr.msra.gmra.mxu0 %v740_v8  ;;  %415 = vmatmul.bf16.vlgmr.msra.gmra.mxu1 %v741_v9 }
  0x37   : > { %420 = vmatmul.bf16.vlgmr.msra.gmra.mxu2 %v742_v10  ;;  %425 = vmatmul.bf16.vlgmr.msra.gmra.mxu3 %v743_v11 }
  0xb3   : > { %v411_v12 = vpop.f32.mrf.mxu0  ;;  %v416_v13 = vpop.f32.mrf.mxu1 }
  0xb4   : > { %v412_v15 = vadd.f32 %v859_v14, %v411_v12  ;;  %v417_v20 = vadd.f32 %v859_v14, %v416_v13 }
  0xb6   : > { %v461_v23 = vmul.f32 %v412_v15, %v412_v15  ;;  %v463_v28 = vmul.f32 %v417_v20, %v417_v20 }
  0xba   : > { %v421_v16 = vpop.f32.mrf.mxu2  ;;  %v426_v17 = vpop.f32.mrf.mxu3 }
  0xbb   : > { %v413_v18 = vpop.f32.mrf.mxu0  ;;  %v418_v19 = vpop.f32.mrf.mxu1  ;;  %v422_v29 = vadd.f32 %v859_v14, %v421_v16  ;;  %v427_v37 = vadd.f32 %v859_v14, %v426_v17 }
  0xbc   : > { %v414_v21 = vadd.f32 %v859_v14, %v413_v18  ;;  %v419_v22 = vadd.f32 %v859_v14, %v418_v19 }
  0xbd   : > { %v465_v40 = vmul.f32 %v422_v29, %v422_v29  ;;  %v467_v48 = vmul.f32 %v427_v37, %v427_v37 }
  0xbe   : > { %v755_v24 = vpack.c.bf16 %v414_v21, %v412_v15  ;;  %v447_v25 = vadd.f32 %v414_v21, %v412_v15  ;;  %v462_v26 = vmul.f32 %v414_v21, %v414_v21  ;;  %v760_v27 = vpack.c.bf16 %v419_v22, %v417_v20 }
  0xbf   : > { %v464_v33 = vmul.f32 %v419_v22, %v419_v22 }
  0xc0   : > { %756 = vst [vmem:[%s300_s24] sm:$0xff] %v755_v24   ;;  %v469_v30 = vadd.f32 %v462_v26, %v461_v23  ;;  %v448_v31 = vadd.f32 %v447_v25, %v417_v20 }
  0xc1   : > { %772 = vst [vmem:[%s300_s24 + $0x8] sm:$0xff] %v760_v27  }
  0xc2   : > { %v449_v32 = vadd.f32 %v448_v31, %v419_v22  ;;  %v470_v34 = vadd.f32 %v469_v30, %v463_v28  ;;  %v423_v35 = vpop.f32.mrf.mxu2  ;;  %v428_v36 = vpop.f32.mrf.mxu3 }
  0xc3   : > { %v424_v38 = vadd.f32 %v859_v14, %v423_v35  ;;  %v429_v39 = vadd.f32 %v859_v14, %v428_v36 }
  0xc4   : > { %v471_v41 = vadd.f32 %v470_v34, %v464_v33  ;;  %v450_v42 = vadd.f32 %v449_v32, %v422_v29 }
  0xc5   : > { %v765_v43 = vpack.c.bf16 %v424_v38, %v422_v29  ;;  %v770_v44 = vpack.c.bf16 %v429_v39, %v427_v37  ;;  %v466_v46 = vmul.f32 %v424_v38, %v424_v38  ;;  %v468_v52 = vmul.f32 %v429_v39, %v429_v39 }
  0xc6   : > { %v451_v45 = vadd.f32 %v450_v42, %v424_v38  ;;  %v472_v47 = vadd.f32 %v471_v41, %v465_v40 }
  0xc7   : > { %773 = vst [vmem:[%s300_s24 + $0x10] sm:$0xff] %v765_v43  }
  0xc8   : > { %v473_v49 = vadd.f32 %v472_v47, %v466_v46  ;;  %774 = vst [vmem:[%s300_s24 + $0x18] sm:$0xff] %v770_v44   ;;  %v452_v50 = vadd.f32 %v451_v45, %v427_v37  ;;  %s876_s24 = scalar_lea.hbm %s875_s17, 1 }
  0xc9   : > { %p877_p12 = scmp.ne.s32.totalorder %s875_s17, %s876_s24  ;;  %p882_p2 = scmp.lt.s32.totalorder %s880_s29, %s876_s24 }
  0xca   : > { %v453_v51 = vadd.f32 %v452_v50, %v429_v39  ;;  %v474_v53 = vadd.f32 %v473_v49, %v467_v48 }
  0xcb   : > { %p878_p13 = pnand %p877_p12, %p1042_p4  ;;  %p883_p3 = por %p882_p2, %p881_p1 }
  0xcc   : > { %v454_v54 = vrot.slane %v453_v51, 4  ;;  %v475_v55 = vadd.f32 %v474_v53, %v468_v52 }
  0xcd   : > { %p879_p0 = pneg %p878_p13 }
  0xce   : > { %v455_v56 = vadd.f32 %v454_v54, %v453_v51  ;;  %v476_v57 = vrot.slane %v475_v55, 4 }
  0xcf   : > { %p884_p5 = pnand %p883_p3, %p879_p0 }
  0xd0   : > { %v456_v58 = vrot.slane %v455_v56, 2  ;;  %v477_v59 = vadd.f32 %v476_v57, %v475_v55 }
  0xd2   : > { %v457_v60 = vadd.f32 %v456_v58, %v455_v56  ;;  %v478_v61 = vrot.slane %v477_v59, 2 }
  0xd4   : > { %v458_v62 = vrot.slane %v457_v60, 1  ;;  %v479_v63 = vadd.f32 %v478_v61, %v477_v59 }
  0xd6   : > { %v459_v0 = vadd.f32 %v458_v62, %v457_v60  ;;  %v480_v1 = vrot.slane %v479_v63, 1 }
  0xd8   : > { %460 = vst [vmem:[%s273_s10] sm:$0x1] %v459_v0  ;;  %v481_v2 = vadd.f32 %v480_v1, %v479_v63 }
  0xd9   : > { %887 = shalt.err (!%p884_p5)
}
  0xda   : > { %799 = dma.vmem_to_hbm [thread:$0]  (%p1042_p4), %s512_s11, 16, %s514_s12, %s492_s21   ;;  %482 = vst [vmem:[%s279_s13] sm:$0x1] %v481_v2 }
  0xdb   : > { %s496_s9 = scalar_lea.sflag [#allocation5], %s1099_s15  ;;  %s902_s10 = sshra.s32 %s528_s16, 4  ;;  %s903_s10 = int_to_ptr.hbm [resolvable:$true] %s902_s10 }
  0xdc   : > { %s904_s25 = scalar_lea.hbm %s903_s10, 1  ;;  %s908_s27 = scalar_lea.hbm %s1178_s5, 2 }
  0xdd   : > { %p905_p6 = scmp.ne.s32.totalorder %s903_s10, %s904_s25  ;;  %p909_p10 = scmp.lt.s32.totalorder %s903_s10, %s1178_s5 }
  0xde   : > { %p910_p11 = scmp.lt.s32.totalorder %s908_s27, %s904_s25 }
  0xdf   : > { %p906_p7 = pnand %p905_p6, %p1042_p4 }
  0xe0   : > { %p911_p12 = por %p910_p11, %p909_p10 }
  0xe1   : > { %p907_p9 = pneg %p906_p7 }
  0xe3   : > { %p912_p13 = pnand %p911_p12, %p907_p9 }
  0xe5   : > { %915 = shalt.err (!%p912_p13)
}
  0xe6   : > { %800 = dma.vmem_to_hbm [thread:$0]  (%p1042_p4), %s526_s14, 16, %s528_s16, %s496_s9  }
  0xe7 PF: > { %p810_p0 = scmp.ge.s32.totalorder %s970_s23, 2  ;;  %s550_s15 = sand.u32 1, %s950_s18  }
  0xe8   : > { %s551_s11 = scalar_lea.sflag [#allocation3], %s550_s15 }
  0xe9   : > { %p804_p1 = pnand %p810_p0, %p1049_p8 }
  0xeb   : > { %p805_p2 = pneg %p804_p1 }
  0xed   : > { %941 = dma.done.wait (%p805_p2), %s551_s11, 16  }
  0xee   : > { %943 = vsyncadd (%p805_p2), %s551_s11, 4294967280  ;;  %s560_s12 = scalar_lea.sflag [#allocation5], %s550_s15 }
  0xef   : > { %945 = dma.done.wait (%p805_p2), %s560_s12, 16  }
  0xf0   : > { %947 = vsyncadd (%p805_p2), %s560_s12, 4294967280  ;;  %s22_s23 = sadd.s32 1, %s970_s23   ;;  %s1181_s18 = smov %s954_s19 }
  0xf1   : > { %p19_p3 = scmp.ge.s32.totalorder %s22_s23, 4   ;;  %s1182_s19 = smov %s958_s20 }
  0xf2   : > { %s1183_s20 = smov %s1055_s6  ;;  %s1184_s21 = smov %s966_s22 }
  0xf3   : > { %s1185_s22 = smov %s1187_s26  ;;  %21 = sbr.rel (!%p19_p3) target bundleno = 6 (0x6), region = 102 }
  0xf8   :  { %565 = vsyncpa [#allocation3], 1 }
  0xf9   :  { %567 = vsyncpa [#allocation3 + $0x1], 1 }
  0xfa   :  { %568 = vsyncpa [#allocation5], 1 }
  0xfb   :  { %570 = vsyncpa [#allocation5 + $0x1], 1 }

// kernel: resblock_apply.6
= control target key start
LH: loop header
LB: loop body
LE: loop exit
PB: predicated region body
PF: predicated region fallthrough
CT: control target
= control target key end

     0   :  { %s385_s12 = smov 0   ;;  %s415_s0 = inlined_call_operand.vmem [shape: bf16[128,128], index: 0, kind: input, shape index: {}]   ;;  %s416_s1 = inlined_call_operand.vmem [shape: f32[1,128], index: 1, kind: input, shape index: {}]   ;;  %s417_s2 = inlined_call_operand.vmem [shape: f32[1,128], index: 2, kind: input, shape index: {}]   ;;  %s418_s3 = inlined_call_operand.vmem [shape: bf16[128,128], index: 3, kind: output, shape index: {}]  }
   0x1 LB: > { %s294_s13 = sadd.s32 4294967295, %s363_s12   ;;  %p298_p0 = scmp.ge.s32.totalorder %s363_s12, 1  ;;  %s363_s12 = sphi %s385_s12, %s13_s12  }
   0x2   : > { %p138_p1 = scmp.lt.s32.totalorder %s363_s12, 3 }
   0x4   : > { %p139_p2 = pnand %p298_p0, %p138_p1 }
   0x5   : > { %s299_s14 = sshll.u32 (!%p139_p2), %s294_s13, 3 }
   0x6   : > { %142 = sbr.rel (%p139_p2) target bundleno = 29 (0x1d), region = 32  ;;  %p163_p3 = scmp.lt.s32.totalorder (!%p139_p2), %s299_s14, 15 }
   0xb   : > { %s420_s14 = smov (!%p163_p3, %s299_s14), 15  ;;  %v355_v0 = vld [vmem:[%s416_s1] ss:$0 sm:$0xff] }
   0xc   : > { %s300_s15 = sshll.u32 %s420_s14, 2  ;;  %v356_v6 = vld [vmem:[%s417_s2] ss:$0 sm:$0xff] }
   0xd   : > { %s166_s18 = scalar_lea.vmem %s415_s0, %s300_s15  ;;  %s172_s25 = scalar_lea.vmem %s418_s3, %s300_s15 }
   0xe   : > { %v306_v1 = vld [vmem:[%s166_s18] sm:$0xff]   ;;  %v341_v2 = vld [vmem:[%s166_s18 + $0x8] sm:$0xff]   ;;  %v342_v3 = vld [vmem:[%s166_s18 + $0x10] sm:$0xff]  }
   0xf   : > { %v307_v4 = vunpack.c.l.bf16 %v306_v1  ;;  %v308_v5 = vunpack.c.h.bf16 %v306_v1  ;;  %v311_v7 = vunpack.c.l.bf16 %v341_v2  ;;  %v312_v8 = vunpack.c.h.bf16 %v341_v2  ;;  %v343_v9 = vld [vmem:[%s166_s18 + $0x18] sm:$0xff]  }
  0x10   : > { %v315_v10 = vunpack.c.l.bf16 %v342_v3  ;;  %v316_v11 = vunpack.c.h.bf16 %v342_v3  ;;  %v319_v12 = vunpack.c.l.bf16 %v343_v9  ;;  %v320_v13 = vunpack.c.h.bf16 %v343_v9 }
  0x11   : > { %v194_v14 = vmul.f32 %v355_v0, %v307_v4  ;;  %v195_v15 = vmul.f32 %v355_v0, %v308_v5  ;;  %v196_v16 = vmul.f32 %v355_v0, %v311_v7  ;;  %v197_v17 = vmul.f32 %v355_v0, %v312_v8 }
  0x12   : > { %v198_v18 = vmul.f32 %v355_v0, %v315_v10  ;;  %v199_v19 = vmul.f32 %v355_v0, %v316_v11  ;;  %v200_v20 = vmul.f32 %v355_v0, %v319_v12  ;;  %v201_v21 = vmul.f32 %v355_v0, %v320_v13 }
  0x13   : > { %v206_v22 = vadd.f32 %v356_v6, %v194_v14  ;;  %v207_v23 = vadd.f32 %v356_v6, %v195_v15  ;;  %v208_v24 = vadd.f32 %v356_v6, %v196_v16  ;;  %v209_v25 = vadd.f32 %v356_v6, %v197_v17 }
  0x14   : > { %v210_v26 = vadd.f32 %v356_v6, %v198_v18  ;;  %v211_v27 = vadd.f32 %v356_v6, %v199_v19  ;;  %v212_v28 = vadd.f32 %v356_v6, %v200_v20  ;;  %v213_v29 = vadd.f32 %v356_v6, %v201_v21 }
  0x15   : > { %v214_v30 = vmax.f32 %v206_v22, 0.0  ;;  %v215_v31 = vmax.f32 %v207_v23, 0.0  ;;  %v216_v32 = vmax.f32 %v208_v24, 0.0  ;;  %v217_v33 = vmax.f32 %v209_v25, 0.0 }
  0x16   : > { %v218_v34 = vmax.f32 %v210_v26, 0.0  ;;  %v219_v35 = vmax.f32 %v211_v27, 0.0  ;;  %v220_v36 = vmax.f32 %v212_v28, 0.0  ;;  %v221_v37 = vmax.f32 %v213_v29, 0.0 }
  0x17   : > { %v324_v38 = vpack.c.bf16 %v215_v31, %v214_v30  ;;  %v329_v39 = vpack.c.bf16 %v217_v33, %v216_v32 }
  0x18   : > { %v334_v40 = vpack.c.bf16 %v219_v35, %v218_v34  ;;  %v339_v41 = vpack.c.bf16 %v221_v37, %v220_v36 }
  0x19   : > { %325 = vst [vmem:[%s172_s25] sm:$0xff] %v324_v38  }
  0x1a   : > { %344 = vst [vmem:[%s172_s25 + $0x8] sm:$0xff] %v329_v39  }
  0x1b   : > { %345 = vst [vmem:[%s172_s25 + $0x10] sm:$0xff] %v334_v40  }
  0x1c   : > { %346 = vst [vmem:[%s172_s25 + $0x18] sm:$0xff] %v339_v41  }
  0x1d PF: > { %s13_s12 = sadd.s32 1, %s363_s12  }
  0x1e   : > { %p10_p4 = scmp.ge.s32.totalorder %s13_s12, 4  }
  0x20   :  { %12 = sbr.rel (!%p10_p4) target bundleno = 1 (0x1), region = 62 }

// kernel: resblock_apply.5
= control target key start
LH: loop header
LB: loop body
LE: loop exit
PB: predicated region body
PF: predicated region fallthrough
CT: control target
= control target key end

     0   :  { %s1568_s18 = smov 0   ;;  %s1570_s19 = smov 0   ;;  %s1803_s0 = inlined_call_operand.vmem [shape: bf16[128,640], index: 0, kind: input, shape index: {}]   ;;  %s1804_s1 = inlined_call_operand.vmem [shape: bf16[640,128], index: 1, kind: input, shape index: {}]   ;;  %s1805_s2 = inlined_call_operand.vmem [shape: f32[1,128], index: 2, kind: input, shape index: {}]   ;;  %s1806_s3 = inlined_call_operand.vmem [shape: bf16[128,128], index: 3, kind: output, shape index: {0}]   ;;  %s1807_s4 = inlined_call_operand.vmem [shape: f32[2,1,128], index: 4, kind: output, shape index: {1}]   ;;  %s1808_s5 = inlined_call_operand.vmem [shape: f32[2,1,128], index: 5, kind: output, shape index: {2}]  }
   0x1   :  { %s1572_s20 = smov 0  }
   0x2 LB: > { %s28_s21 = sadd.s32 1, %s1532_s19  ;;  %p1142_p0 = scmp.ge.s32.totalorder %s1536_s20, 1  ;;  %s1536_s20 = sphi %s1572_s20, %s16_s20   ;;  %s1532_s19 = sphi %s1570_s19, %s1810_s19   ;;  %s1528_s18 = sphi %s1568_s18, %s1809_s18  }
   0x3   : > { %p30_p1 = scmp.ge.s32.totalorder %s28_s21, 2  ;;  %p229_p2 = scmp.lt.s32.totalorder %s1536_s20, 3 }
   0x5   : > { %s1812_s21 = smov (%p30_p1, %s28_s21), 0  ;;  %p230_p3 = pnand %p1142_p0, %p229_p2 }
   0x6   : > { %s1143_s13 = sshll.u32 (!%p230_p3), %s1528_s18, 3  ;;  %p303_p5 = scmp.lt.s32.totalorder (!%p230_p3), %s1528_s18, 1 }
   0x7   : > { %233 = sbr.rel (%p230_p3) target bundleno = 283 (0x11b), region = 32  ;;  %p281_p4 = scmp.lt.s32.totalorder (!%p230_p3), %s1143_s13, 15 }
   0xc   : > { %v1416_v0 = vld [vmem:[%s1804_s1 + $0x38] sm:$0xff]  ;;  %v1415_v2 = vld [vmem:[%s1804_s1 + $0x30] sm:$0xff]  ;;  %v1414_v6 = vld [vmem:[%s1804_s1 + $0x28] sm:$0xff]  ;;  %s1814_s13 = smov (!%p281_p4, %s1143_s13), 15  ;;  %s1816_s18 = smov (!%p303_p5, %s1528_s18), 1 }
   0xd   : > { %v1432_v1 = vld [vmem:[%s1804_s1 + $0xb8] sm:$0xff]  ;;  %1472 = vmatpush.bf16.msra.mxu1 %v1416_v0  ;;  %767 = vmatpush.bf16.msra.mxu0 %v1416_v0  ;;  %v1431_v3 = vld [vmem:[%s1804_s1 + $0xb0] sm:$0xff]  ;;  %v1430_v7 = vld [vmem:[%s1804_s1 + $0xa8] sm:$0xff]  ;;  %s1488_s9 = smul.u32 20, %s1814_s13  ;;  %s314_s12 = scalar_lea.vmem %s1808_s5, %s1816_s18 }
   0xe   : > { %825 = vmatpush.bf16.msra.mxu2 %v1432_v1  ;;  %v1440_v4 = vld [vmem:[%s1804_s1 + $0xf8] sm:$0xff]  ;;  %v1439_v5 = vld [vmem:[%s1804_s1 + $0xf0] sm:$0xff]  ;;  %v1438_v8 = vld [vmem:[%s1804_s1 + $0xe8] sm:$0xff] }
   0xf   : > { %854 = vmatpush.bf16.msra.mxu3 %v1440_v4  ;;  %v1413_v9 = vld [vmem:[%s1804_s1 + $0x20] sm:$0xff]  ;;  %v1412_v12 = vld [vmem:[%s1804_s1 + $0x18] sm:$0xff]  ;;  %v1411_v15 = vld [vmem:[%s1804_s1 + $0x10] sm:$0xff]  ;;  %s1652_s23 = scalar_lea.vmem %s1803_s0, %s1488_s9  ;;  %s308_s9 = scalar_lea.vmem %s1807_s4, %s1816_s18 }
  0x10   : > { %v1429_v10 = vld [vmem:[%s1804_s1 + $0xa0] sm:$0xff]  ;;  %v1428_v13 = vld [vmem:[%s1804_s1 + $0x98] sm:$0xff]  ;;  %v1427_v16 = vld [vmem:[%s1804_s1 + $0x90] sm:$0xff] }
  0x11   : > { %1473 = vmatpush.bf16.msra.mxu1 %v1415_v2  ;;  %768 = vmatpush.bf16.msra.mxu0 %v1415_v2  ;;  %v1437_v11 = vld [vmem:[%s1804_s1 + $0xe0] sm:$0xff]  ;;  %v1436_v14 = vld [vmem:[%s1804_s1 + $0xd8] sm:$0xff]  ;;  %v1435_v17 = vld [vmem:[%s1804_s1 + $0xd0] sm:$0xff] }
  0x12   : > { %826 = vmatpush.bf16.msra.mxu2 %v1431_v3  ;;  %v1410_v18 = vld [vmem:[%s1804_s1 + $0x8] sm:$0xff]  ;;  %v1409_v20 = vld [vmem:[%s1804_s1] sm:$0xff]  ;;  %v1189_v21 = vld [vmem:[%s1652_s23 + $0x50] sm:$0xf] }
  0x13   : > { %855 = vmatpush.bf16.msra.mxu3 %v1439_v5  ;;  %v1426_v19 = vld [vmem:[%s1804_s1 + $0x88] sm:$0xff]  ;;  %v1424_v22 = vld [vmem:[%s1804_s1 + $0x78] sm:$0xff]  ;;  %v1401_v24 = vld [vmem:[%s1652_s23 + $0x60] sm:$0xf0] }
  0x14   : > { %v1434_v23 = vld [vmem:[%s1804_s1 + $0xc8] sm:$0xff]  ;;  %v1149_v25 = vld [vmem:[%s1652_s23] sm:$0xf]  ;;  %v1391_v26 = vld [vmem:[%s1652_s23 + $0x10] sm:$0xf0]  ;;  %v1190_v31 = vor.u32 %v1401_v24, %v1189_v21 }
  0x15   : > { %1474 = vmatpush.bf16.msra.mxu1 %v1414_v6  ;;  %769 = vmatpush.bf16.msra.mxu0 %v1414_v6  ;;  %v1425_v27 = vld [vmem:[%s1804_s1 + $0x80] sm:$0xff]  ;;  %v1157_v28 = vld [vmem:[%s1652_s23 + $0x8] sm:$0xf]  ;;  %v1392_v29 = vld [vmem:[%s1652_s23 + $0x18] sm:$0xf0]  ;;  %v1150_v32 = vor.u32 %v1391_v26, %v1149_v25 }
  0x16   : > { %827 = vmatpush.bf16.msra.mxu2 %v1430_v7  ;;  %v1448_v30 = vld [vmem:[%s1804_s1 + $0x138] sm:$0xff]  ;;  %v1158_v33 = vor.u32 %v1392_v29, %v1157_v28  ;;  %v1433_v34 = vld [vmem:[%s1804_s1 + $0xc0] sm:$0xff]  ;;  %v1390_v35 = vld [vmem:[%s1652_s23 + $0xc] sm:$0xf] }
  0x17   : > { %856 = vmatpush.bf16.msra.mxu3 %v1438_v8  ;;  %v1159_v36 = vld [vmem:[%s1652_s23 + $0x1c] sm:$0xf0]  ;;  %v1423_v37 = vld [vmem:[%s1804_s1 + $0x70] sm:$0xff]  ;;  %v1422_v40 = vld [vmem:[%s1804_s1 + $0x68] sm:$0xff] }
  0x18   : > { %v1447_v38 = vld [vmem:[%s1804_s1 + $0x130] sm:$0xff]  ;;  %v1162_v39 = vor.u32 %v1390_v35, %v1159_v36  ;;  %v1446_v41 = vld [vmem:[%s1804_s1 + $0x128] sm:$0xff]  ;;  %v1421_v42 = vld [vmem:[%s1804_s1 + $0x60] sm:$0xff] }
  0x19   : > { %1475 = vmatpush.bf16.msra.mxu1 %v1413_v9  ;;  %770 = vmatpush.bf16.msra.mxu0 %v1413_v9  ;;  %v1445_v43 = vld [vmem:[%s1804_s1 + $0x120] sm:$0xff]  ;;  %v1209_v44 = vld [vmem:[%s1652_s23 + $0x78] sm:$0xf]  ;;  %v1406_v45 = vld [vmem:[%s1652_s23 + $0x88] sm:$0xf0] }
  0x1a   : > { %828 = vmatpush.bf16.msra.mxu2 %v1429_v10  ;;  %v1169_v46 = vld [vmem:[%s1652_s23 + $0x28] sm:$0xf]  ;;  %v1396_v47 = vld [vmem:[%s1652_s23 + $0x38] sm:$0xf0]  ;;  %v1177_v49 = vld [vmem:[%s1652_s23 + $0x30] sm:$0xf]  ;;  %v1210_v52 = vor.u32 %v1406_v45, %v1209_v44 }
  0x1b   : > { %857 = vmatpush.bf16.msra.mxu3 %v1437_v11  ;;  %v1420_v48 = vld [vmem:[%s1804_s1 + $0x58] sm:$0xff]  ;;  %v1397_v50 = vld [vmem:[%s1652_s23 + $0x40] sm:$0xf0]  ;;  %v1170_v53 = vor.u32 %v1396_v47, %v1169_v46  ;;  %v1395_v55 = vld [vmem:[%s1652_s23 + $0x34] sm:$0xf] }
  0x1c   : > { %v1444_v51 = vld [vmem:[%s1804_s1 + $0x118] sm:$0xff]  ;;  %v1178_v54 = vor.u32 %v1397_v50, %v1177_v49  ;;  %v1179_v56 = vld [vmem:[%s1652_s23 + $0x44] sm:$0xf0]  ;;  %v1419_v57 = vld [vmem:[%s1804_s1 + $0x50] sm:$0xff] }
  0x1d   : > { %1476 = vmatpush.bf16.msra.mxu1 %v1412_v12  ;;  %771 = vmatpush.bf16.msra.mxu0 %v1412_v12  ;;  %v1443_v58 = vld [vmem:[%s1804_s1 + $0x110] sm:$0xff]  ;;  %v1182_v59 = vor.u32 %v1395_v55, %v1179_v56  ;;  %v1418_v60 = vld [vmem:[%s1804_s1 + $0x48] sm:$0xff]  ;;  %v1417_v62 = vld [vmem:[%s1804_s1 + $0x40] sm:$0xff] }
  0x1e   : > { %829 = vmatpush.bf16.msra.mxu2 %v1428_v13  ;;  %v1442_v61 = vld [vmem:[%s1804_s1 + $0x108] sm:$0xff]  ;;  %v1441_v63 = vld [vmem:[%s1804_s1 + $0x100] sm:$0xff]  ;;  %v1151_v1 = vld [vmem:[%s1652_s23 + $0x14] sm:$0xf0] }
  0x1f   : > { %858 = vmatpush.bf16.msra.mxu3 %v1436_v14  ;;  %v1389_v0 = vld [vmem:[%s1652_s23 + $0x4] sm:$0xf]  ;;  %v1165_v2 = vld [vmem:[%s1652_s23 + $0x10] sm:$0xf]  ;;  %v1197_v4 = vld [vmem:[%s1652_s23 + $0x58] sm:$0xf] }
  0x20   : > { %v1393_v3 = vld [vmem:[%s1652_s23 + $0x20] sm:$0xf0]  ;;  %v1402_v5 = vld [vmem:[%s1652_s23 + $0x68] sm:$0xf0]  ;;  %v1154_v6 = vor.u32 %v1389_v0, %v1151_v1  ;;  %v1400_v9 = vld [vmem:[%s1652_s23 + $0x5c] sm:$0xf] }
  0x21   : > { %1477 = vmatpush.bf16.msra.mxu1 %v1411_v15  ;;  %772 = vmatpush.bf16.msra.mxu0 %v1411_v15  ;;  %v1166_v7 = vor.u32 %v1393_v3, %v1165_v2  ;;  %v1198_v8 = vor.u32 %v1402_v5, %v1197_v4  ;;  %v1199_v10 = vld [vmem:[%s1652_s23 + $0x6c] sm:$0xf0]  ;;  %v1394_v12 = vld [vmem:[%s1652_s23 + $0x2c] sm:$0xf]  ;;  %v1171_v13 = vld [vmem:[%s1652_s23 + $0x3c] sm:$0xf0] }
  0x22   : > { %830 = vmatpush.bf16.msra.mxu2 %v1427_v16  ;;  %v1202_v11 = vor.u32 %v1400_v9, %v1199_v10  ;;  %v1185_v14 = vld [vmem:[%s1652_s23 + $0x38] sm:$0xf]  ;;  %v1398_v15 = vld [vmem:[%s1652_s23 + $0x48] sm:$0xf0]  ;;  %v1217_v16 = vld [vmem:[%s1652_s23 + $0x80] sm:$0xf] }
  0x23   : > { %859 = vmatpush.bf16.msra.mxu3 %v1435_v17  ;;  %v1407_v17 = vld [vmem:[%s1652_s23 + $0x90] sm:$0xf0]  ;;  %v1405_v21 = vld [vmem:[%s1652_s23 + $0x84] sm:$0xf]  ;;  %v1191_v25 = vld [vmem:[%s1652_s23 + $0x64] sm:$0xf0] }
  0x24   : > { %v1399_v24 = vld [vmem:[%s1652_s23 + $0x54] sm:$0xf]  ;;  %v1205_v26 = vld [vmem:[%s1652_s23 + $0x60] sm:$0xf]  ;;  %v1225_v28 = vld [vmem:[%s1652_s23 + $0x88] sm:$0xf] }
  0x25   : > { %1478 = vmatpush.bf16.msra.mxu1 %v1410_v18  ;;  %773 = vmatpush.bf16.msra.mxu0 %v1410_v18  ;;  %v1174_v18 = vor.u32 %v1394_v12, %v1171_v13  ;;  %v1408_v29 = vld [vmem:[%s1652_s23 + $0x98] sm:$0xf0] }
  0x26   : > { %831 = vmatpush.bf16.msra.mxu2 %v1426_v19  ;;  %v1186_v19 = vor.u32 %v1398_v15, %v1185_v14 }
  0x27   : > { %860 = vmatpush.bf16.msra.mxu3 %v1434_v23 }
  0x29   : > { %1479 = vmatpush.bf16.msra.mxu1 %v1409_v20  ;;  %774 = vmatpush.bf16.msra.mxu0 %v1409_v20  ;;  %v1218_v20 = vor.u32 %v1407_v17, %v1217_v16 }
  0x2a   : > { %832 = vmatpush.bf16.msra.mxu2 %v1425_v27  ;;  %v1403_v27 = vld [vmem:[%s1652_s23 + $0x70] sm:$0xf0] }
  0x2b   : > { %861 = vmatpush.bf16.msra.mxu3 %v1433_v34  ;;  %v1211_v34 = vld [vmem:[%s1652_s23 + $0x8c] sm:$0xf0] }
  0x2c   : > { %785 = vmatmul.bf16.vlgmr.msra.gmra.mxu1 %v1190_v31  ;;  %775 = vmatmul.bf16.vlgmr.msra.gmra.mxu0 %v1150_v32  ;;  %v1206_v31 = vor.u32 %v1403_v27, %v1205_v26  ;;  %v1226_v32 = vor.u32 %v1408_v29, %v1225_v28 }
  0x2d   : > { %796 = vmatpush.bf16.msrb.mxu1 %v1424_v22  ;;  %883 = vmatpush.bf16.msrb.mxu0 %v1448_v30  ;;  %v1219_v22 = vld [vmem:[%s1652_s23 + $0x94] sm:$0xf0] }
  0x2e   : > { %1480 = vmatpush.bf16.msrb.mxu2 %v1448_v30  ;;  %862 = vmatmul.bf16.vlgmr.msra.gmra.mxu3 %v1162_v39  ;;  %v1222_v23 = vor.u32 %v1405_v21, %v1219_v22  ;;  %v1194_v30 = vor.u32 %v1399_v24, %v1191_v25 }
  0x2f   : > { %833 = vmatmul.bf16.vlgmr.msra.gmra.mxu2 %v1158_v33  ;;  %v1404_v33 = vld [vmem:[%s1652_s23 + $0x7c] sm:$0xf]  ;;  %s1146_s23 = sshll.u32 %s1814_s13, 2 }
  0x30   : > { %v1214_v35 = vor.u32 %v1404_v33, %v1211_v34  ;;  %s1772_s7 = scalar_lea.vmem %s1806_s3, %s1146_s23 }
  0x31   : > { %797 = vmatpush.bf16.msrb.mxu1 %v1423_v37  ;;  %884 = vmatpush.bf16.msrb.mxu0 %v1447_v38 }
  0x32   : > { %1481 = vmatpush.bf16.msrb.mxu2 %v1447_v38 }
  0x35   : > { %798 = vmatpush.bf16.msrb.mxu1 %v1422_v40  ;;  %885 = vmatpush.bf16.msrb.mxu0 %v1446_v41 }
  0x36   : > { %1482 = vmatpush.bf16.msrb.mxu2 %v1446_v41 }
  0x39   : > { %799 = vmatpush.bf16.msrb.mxu1 %v1421_v42  ;;  %886 = vmatpush.bf16.msrb.mxu0 %v1445_v43 }
  0x3a   : > { %1483 = vmatpush.bf16.msrb.mxu2 %v1445_v43 }
  0x3c   : > { %790 = vmatmul.bf16.gmra.mxu1 %v1210_v52  ;;  %780 = vmatmul.bf16.gmra.mxu0 %v1170_v53 }
  0x3d   : > { %800 = vmatpush.bf16.msrb.mxu1 %v1420_v48  ;;  %887 = vmatpush.bf16.msrb.mxu0 %v1444_v51  ;;  %v1764_v48 = vld [vmem:[%s1805_s2] ss:$0 sm:$0xff] }
  0x3e   : > { %1484 = vmatpush.bf16.msrb.mxu2 %v1444_v51  ;;  %867 = vmatmul.bf16.gmra.mxu3 %v1182_v59 }
  0x3f   : > { %838 = vmatmul.bf16.gmra.mxu2 %v1178_v54 }
  0x41   : > { %801 = vmatpush.bf16.msrb.mxu1 %v1419_v57  ;;  %888 = vmatpush.bf16.msrb.mxu0 %v1443_v58 }
  0x42   : > { %1485 = vmatpush.bf16.msrb.mxu2 %v1443_v58 }
  0x45   : > { %802 = vmatpush.bf16.msrb.mxu1 %v1418_v60  ;;  %889 = vmatpush.bf16.msrb.mxu0 %v1442_v61 }
  0x46   : > { %1486 = vmatpush.bf16.msrb.mxu2 %v1442_v61 }
  0x49   : > { %803 = vmatpush.bf16.msrb.mxu1 %v1417_v62  ;;  %890 = vmatpush.bf16.msrb.mxu0 %v1441_v63 }
  0x4a   : > { %1487 = vmatpush.bf16.msrb.mxu2 %v1441_v63 }
  0x4c   : > { %804 = vmatmul.bf16.vlgmr.msrb.gmra.mxu1 %v1154_v6  ;;  %891 = vmatmul.bf16.vlgmr.msrb.gmra.mxu0 %v1166_v7 }
  0x4e   : > { %872 = vmatmul.bf16.gmra.mxu3 %v1202_v11 }
  0x4f   : > { %843 = vmatmul.bf16.gmra.mxu2 %v1198_v8 }
  0x5c   : > { %809 = vmatmul.bf16.gmra.mxu1 %v1174_v18  ;;  %896 = vmatmul.bf16.gmra.mxu0 %v1186_v19 }
  0x5e   : > { %877 = vmatmul.bf16.gmra.mxu3 %v1222_v23 }
  0x5f   : > { %848 = vmatmul.bf16.gmra.mxu2 %v1218_v20 }
  0x6c   : > { %814 = vmatmul.bf16.gmra.mxu1 %v1194_v30  ;;  %901 = vmatmul.bf16.gmra.mxu0 %v1206_v31 }
  0x6f   : > { %906 = vmatmul.bf16.vlgmr.msrb.gmra.mxu2 %v1226_v32 }
  0x7c   : > { %819 = vmatmul.bf16.gmra.mxu1 %v1214_v35 }
  0xa9   : > { %v786_v36 = vpop.f32.mrf.mxu1  ;;  %v776_v37 = vpop.f32.mrf.mxu0 }
  0xaa   : > { %v777_v52 = vadd.f32 %v1764_v48, %v776_v37  ;;  %v787_v23 = vadd.f32 %v1764_v48, %v786_v36 }
  0xb1   : > { %v788_v39 = vpop.f32.mrf.mxu1  ;;  %v778_v40 = vpop.f32.mrf.mxu0 }
  0xb2   : > { %v834_v38 = vpop.f32.mrf.mxu2  ;;  %v863_v44 = vpop.f32.mrf.mxu3  ;;  %v779_v55 = vadd.f32 %v1764_v48, %v778_v40  ;;  %v789_v27 = vadd.f32 %v1764_v48, %v788_v39 }
  0xb9   : > { %v1757_v42 = vpop.f32.mrf.mxu1  ;;  %v781_v43 = vpop.f32.mrf.mxu0 }
  0xba   : > { %v836_v41 = vpop.f32.mrf.mxu2  ;;  %v865_v49 = vpop.f32.mrf.mxu3  ;;  %v782_v5 = vadd.f32 %v1764_v48, %v781_v43  ;;  %v792_v40 = vadd.f32 %v1764_v48, %v1757_v42 }
  0xc1   : > { %v1759_v46 = vpop.f32.mrf.mxu1  ;;  %v783_v47 = vpop.f32.mrf.mxu0 }
  0xc2   : > { %v839_v45 = vpop.f32.mrf.mxu2  ;;  %v868_v60 = vpop.f32.mrf.mxu3  ;;  %v784_v10 = vadd.f32 %v1764_v48, %v783_v47 }
  0xc9   : > { %v805_v50 = vpop.f32.mrf.mxu1  ;;  %v892_v51 = vpop.f32.mrf.mxu0 }
  0xca   : > { %v841_v53 = vpop.f32.mrf.mxu2  ;;  %v806_v54 = vadd.f32 %v805_v50, %v777_v52  ;;  %v870_v8 = vpop.f32.mrf.mxu3 }
  0xcc   : > { %v835_v56 = vadd.f32 %v834_v38, %v806_v54 }
  0xce   : > { %v864_v61 = vadd.f32 %v863_v44, %v835_v56 }
  0xd0   : > { %v893_v1 = vadd.f32 %v892_v51, %v864_v61 }
  0xd1   : > { %v807_v57 = vpop.f32.mrf.mxu1  ;;  %v894_v58 = vpop.f32.mrf.mxu0 }
  0xd2   : > { %v808_v59 = vadd.f32 %v807_v57, %v779_v55  ;;  %v844_v63 = vpop.f32.mrf.mxu2  ;;  %v873_v18 = vpop.f32.mrf.mxu3  ;;  %v942_v36 = vmul.f32 %v893_v1, %v893_v1 }
  0xd4   : > { %v837_v62 = vadd.f32 %v836_v41, %v808_v59 }
  0xd6   : > { %v866_v0 = vadd.f32 %v865_v49, %v837_v62  ;;  %v794_v62 = vadd.f32 %v1764_v48, %v1759_v46 }
  0xd8   : > { %v895_v2 = vadd.f32 %v894_v58, %v866_v0 }
  0xd9   : > { %v810_v3 = vpop.f32.mrf.mxu1  ;;  %v897_v4 = vpop.f32.mrf.mxu0 }
  0xda   : > { %v1452_v6 = vpack.c.bf16 %v895_v2, %v893_v1  ;;  %v811_v7 = vadd.f32 %v810_v3, %v782_v5  ;;  %v846_v9 = vpop.f32.mrf.mxu2  ;;  %v875_v29 = vpop.f32.mrf.mxu3  ;;  %v943_v35 = vmul.f32 %v895_v2, %v895_v2  ;;  %v928_v41 = vadd.f32 %v895_v2, %v893_v1 }
  0xdc   : > { %1453 = vst [vmem:[%s1772_s7] sm:$0xff] %v1452_v6   ;;  %v840_v11 = vadd.f32 %v839_v45, %v811_v7  ;;  %v950_v39 = vadd.f32 %v943_v35, %v942_v36 }
  0xde   : > { %v869_v15 = vadd.f32 %v868_v60, %v840_v11 }
  0xe0   : > { %v898_v19 = vadd.f32 %v897_v4, %v869_v15 }
  0xe1   : > { %v812_v12 = vpop.f32.mrf.mxu1  ;;  %v899_v13 = vpop.f32.mrf.mxu0 }
  0xe2   : > { %v813_v14 = vadd.f32 %v812_v12, %v784_v10  ;;  %v849_v21 = vpop.f32.mrf.mxu2  ;;  %v944_v43 = vmul.f32 %v898_v19, %v898_v19  ;;  %v929_v49 = vadd.f32 %v928_v41, %v898_v19 }
  0xe4   : > { %v842_v16 = vadd.f32 %v841_v53, %v813_v14  ;;  %v878_v53 = vpop.f32.mrf.mxu3  ;;  %v951_v54 = vadd.f32 %v950_v39, %v944_v43 }
  0xe6   : > { %v871_v17 = vadd.f32 %v870_v8, %v842_v16 }
  0xe8   : > { %v900_v20 = vadd.f32 %v899_v13, %v871_v17 }
  0xe9   : > { %v815_v22 = vpop.f32.mrf.mxu1  ;;  %v902_v25 = vpop.f32.mrf.mxu0 }
  0xea   : > { %v1457_v24 = vpack.c.bf16 %v900_v20, %v898_v19  ;;  %v816_v26 = vadd.f32 %v815_v22, %v787_v23  ;;  %v851_v32 = vpop.f32.mrf.mxu2  ;;  %v945_v50 = vmul.f32 %v900_v20, %v900_v20  ;;  %v930_v55 = vadd.f32 %v929_v49, %v900_v20 }
  0xec   : > { %1469 = vst [vmem:[%s1772_s7 + $0x8] sm:$0xff] %v1457_v24   ;;  %v845_v28 = vadd.f32 %v844_v63, %v816_v26  ;;  %v952_v42 = vadd.f32 %v951_v54, %v945_v50 }
  0xee   : > { %v874_v33 = vadd.f32 %v873_v18, %v845_v28 }
  0xf0   : > { %v903_v44 = vadd.f32 %v902_v25, %v874_v33 }
  0xf1   : > { %v817_v30 = vpop.f32.mrf.mxu1  ;;  %v904_v37 = vpop.f32.mrf.mxu0 }
  0xf2   : > { %v818_v31 = vadd.f32 %v817_v30, %v789_v27  ;;  %v946_v56 = vmul.f32 %v903_v44, %v903_v44  ;;  %v907_v58 = vpop.f32.mrf.mxu2  ;;  %v931_v59 = vadd.f32 %v930_v55, %v903_v44 }
  0xf4   : > { %v847_v34 = vadd.f32 %v846_v9, %v818_v31  ;;  %v953_v63 = vadd.f32 %v952_v42, %v946_v56  ;;  %v880_v9 = vpop.f32.mrf.mxu3 }
  0xf6   : > { %v876_v38 = vadd.f32 %v875_v29, %v847_v34 }
  0xf8   : > { %v905_v45 = vadd.f32 %v904_v37, %v876_v38 }
  0xf9   : > { %v820_v47 = vpop.f32.mrf.mxu1 }
  0xfa   : > { %v1462_v51 = vpack.c.bf16 %v905_v45, %v903_v44  ;;  %v821_v52 = vadd.f32 %v820_v47, %v792_v40  ;;  %v947_v60 = vmul.f32 %v905_v45, %v905_v45  ;;  %v932_v0 = vadd.f32 %v931_v59, %v905_v45  ;;  %v909_v11 = vpop.f32.mrf.mxu2 }
  0xfc   : > { %1470 = vst [vmem:[%s1772_s7 + $0x10] sm:$0xff] %v1462_v51   ;;  %v850_v57 = vadd.f32 %v849_v21, %v821_v52  ;;  %v954_v3 = vadd.f32 %v953_v63, %v947_v60 }
  0xfe   : > { %v879_v61 = vadd.f32 %v878_v53, %v850_v57 }
 0x100   : > { %v908_v1 = vadd.f32 %v907_v58, %v879_v61 }
 0x101   : > { %v822_v2 = vpop.f32.mrf.mxu1 }
 0x102   : > { %v933_v4 = vadd.f32 %v932_v0, %v908_v1  ;;  %v948_v5 = vmul.f32 %v908_v1, %v908_v1  ;;  %v823_v6 = vadd.f32 %v822_v2, %v794_v62 }
 0x104   : > { %v955_v7 = vadd.f32 %v954_v3, %v948_v5  ;;  %v852_v8 = vadd.f32 %v851_v32, %v823_v6 }
 0x106   : > { %v881_v10 = vadd.f32 %v880_v9, %v852_v8 }
 0x108   : > { %v910_v12 = vadd.f32 %v909_v11, %v881_v10 }
 0x10a   : > { %v1467_v13 = vpack.c.bf16 %v910_v12, %v908_v1  ;;  %v934_v14 = vadd.f32 %v933_v4, %v910_v12  ;;  %v949_v46 = vmul.f32 %v910_v12, %v910_v12 }
 0x10c   : > { %1471 = vst [vmem:[%s1772_s7 + $0x18] sm:$0xff] %v1467_v13   ;;  %v935_v48 = vrot.slane %v934_v14, 4  ;;  %v956_v15 = vadd.f32 %v955_v7, %v949_v46 }
 0x10e   : > { %v936_v16 = vadd.f32 %v935_v48, %v934_v14  ;;  %v957_v17 = vrot.slane %v956_v15, 4 }
 0x110   : > { %v937_v18 = vrot.slane %v936_v16, 2  ;;  %v958_v19 = vadd.f32 %v957_v17, %v956_v15 }
 0x112   : > { %v938_v20 = vadd.f32 %v937_v18, %v936_v16  ;;  %v959_v21 = vrot.slane %v958_v19, 2 }
 0x114   : > { %v939_v22 = vrot.slane %v938_v20, 1  ;;  %v960_v23 = vadd.f32 %v959_v21, %v958_v19 }
 0x116   : > { %v940_v24 = vadd.f32 %v939_v22, %v938_v20  ;;  %v961_v25 = vrot.slane %v960_v23, 1 }
 0x118   : > { %941 = vst [vmem:[%s308_s9] sm:$0x1] %v940_v24  ;;  %v962_v26 = vadd.f32 %v961_v25, %v960_v23 }
 0x11a   : > { %963 = vst [vmem:[%s314_s12] sm:$0x1] %v962_v26 }
 0x11b PF: > { %s16_s20 = sadd.s32 1, %s1536_s20   ;;  %s1809_s18 = smov %s1532_s19 }
 0x11c   : > { %p13_p6 = scmp.ge.s32.totalorder %s16_s20, 4   ;;  %s1810_s19 = smov %s1812_s21 }
 0x11e   :  { %15 = sbr.rel (!%p13_p6) target bundleno = 2 (0x2), region = 92 }

// kernel: resblock_apply.9
= control target key start
LH: loop header
LB: loop body
LE: loop exit
PB: predicated region body
PF: predicated region fallthrough
CT: control target
= control target key end

     0   :  { %9 = vsyncpa [#allocation3], 0  ;;  %s685_s0 = inlined_call_operand.vmem [shape: bf16[128,128], index: 0, kind: input, shape index: {}]   ;;  %s686_s1 = inlined_call_operand.vmem [shape: f32[1,128], index: 1, kind: input, shape index: {}]   ;;  %s687_s2 = inlined_call_operand.vmem [shape: f32[1,128], index: 2, kind: input, shape index: {}]   ;;  %s688_s3 = inlined_call_operand.vmem [shape: bf16[128,128], index: 3, kind: input, shape index: {}]   ;;  %s689_s4 = inlined_call_operand.hbm [shape: f32[128,128], index: 4, kind: output, shape index: {}]  }
   0x1   :  { %11 = vsyncpa [#allocation3 + $0x1], 0  ;;  %s578_s15 = smov 0   ;;  %s580_s16 = smov 0  }
   0x2   :  { %s582_s17 = smov 0   ;;  %s584_s18 = smov 0  }
   0x3 LB: > { %s599_s19 = sadd.s32 4294967295, %s549_s18   ;;  %s391_s20 = sadd.s32 4294967294, %s549_s18   ;;  %s549_s18 = sphi %s584_s18, %s695_s18   ;;  %s545_s17 = sphi %s582_s17, %s694_s17   ;;  %s541_s16 = sphi %s580_s16, %s693_s16   ;;  %s537_s15 = sphi %s578_s15, %s692_s15  }
   0x4   : > { %s603_s21 = sadd.s32 1, %s549_s18   ;;  %s118_s22 = sadd.s32 1, %s545_s17 }
   0x5   : > { %s115_s23 = ssub.s32 %s549_s18, %s603_s21  ;;  %p128_p0 = scmp.ne.s32.totalorder %s545_s17, %s541_s16 }
   0x6   : > { %p116_p1 = scmp.eq.s32.totalorder %s115_s23, 0  ;;  %p129_p2 = scmp.eq.s32.totalorder %s599_s19, 1 }
   0x7   : > { %p134_p3 = scmp.ne.s32.totalorder %s541_s16, %s537_s15  ;;  %p135_p4 = scmp.eq.s32.totalorder %s391_s20, 1 }
   0x8   : > { %s614_s24 = scalar_select %p116_p1, %s545_s17, %s118_s22  }
   0x9   : > { %p616_p5 = por %p129_p2, %p128_p0  ;;  %p620_p6 = por %p135_p4, %p134_p3 }
   0xa   : > { %p394_p7 = scmp.ge.s32.totalorder %s549_s18, 1  ;;  %p177_p8 = scmp.lt.s32.totalorder %s549_s18, 3 }
   0xc   : > { %p178_p9 = pnand %p394_p7, %p177_p8 }
   0xd   : > { %s396_s27 = sshll.u32 (!%p178_p9), %s599_s19, 3  ;;  %s205_s13 = sand.u32 (!%p178_p9), 1, %s541_s16  }
   0xe   : > { %181 = sbr.rel (%p178_p9) target bundleno = 45 (0x2d), region = 36  ;;  %p209_p10 = scmp.lt.s32.totalorder (!%p178_p9), %s396_s27, 15 }
   0xf   : > { %s395_s14 = sshll.u32 (!%p178_p9), %s205_s13, 6  ;;  %s405_s20 = sshll.u32 (!%p178_p9), %s599_s19, 6 }
  0x10   : > { %s207_s22 = scalar_lea.vmem (!%p178_p9), [#allocation2], %s395_s14  ;;  %s302_s30 = scalar_lea.sflag (!%p178_p9), [#allocation3], %s205_s13 }
  0x11   : > { %s314_s19 = sshll.u32 (!%p178_p9), %s207_s22, 4  ;;  %s507_s9 = scalar_lea.hbm (!%p178_p9), %s689_s4, 128  ;;  %s315_s19 = int_to_ptr.vmem [resolvable:$true] %s314_s19 }
  0x13   : > { %s697_s27 = smov (!%p209_p10, %s396_s27), 15  ;;  %v485_v0 = vld [vmem:[%s686_s1] ss:$0 sm:$0xff] }
  0x14   : > { %s397_s28 = sshll.u32 %s697_s27, 2  ;;  %v639_v1 = vld [vmem:[%s687_s2] ss:$0 sm:$0xff] }
  0x15   : > { %s212_s5 = scalar_lea.vmem %s685_s0, %s397_s28  ;;  %s218_s8 = scalar_lea.vmem %s688_s3, %s397_s28 }
  0x16   : > { %v407_v2 = vld [vmem:[%s212_s5] sm:$0xff]   ;;  %v438_v4 = vld [vmem:[%s212_s5 + $0x8] sm:$0xff]   ;;  %v439_v10 = vld [vmem:[%s212_s5 + $0x10] sm:$0xff]   ;;  %s313_s28 = scalar_lea.hbm %s689_s4, %s405_s20 }
  0x17   : > { %v423_v3 = vld [vmem:[%s218_s8] sm:$0xff]   ;;  %v408_v5 = vunpack.c.l.bf16 %v407_v2  ;;  %v409_v7 = vunpack.c.h.bf16 %v407_v2  ;;  %v441_v9 = vld [vmem:[%s218_s8 + $0x8] sm:$0xff]   ;;  %v442_v11 = vld [vmem:[%s218_s8 + $0x10] sm:$0xff]   ;;  %v412_v12 = vunpack.c.l.bf16 %v438_v4  ;;  %v413_v14 = vunpack.c.h.bf16 %v438_v4  ;;  %s316_s29 = sshll.u32 %s313_s28, 4  ;;  %s317_s29 = int_to_ptr.hbm [resolvable:$true] %s316_s29 }
  0x18   : > { %v424_v6 = vunpack.c.l.bf16 %v423_v3  ;;  %v425_v8 = vunpack.c.h.bf16 %v423_v3  ;;  %v428_v13 = vunpack.c.l.bf16 %v441_v9  ;;  %v429_v15 = vunpack.c.h.bf16 %v441_v9  ;;  %v440_v16 = vld [vmem:[%s212_s5 + $0x18] sm:$0xff]   ;;  %s501_s5 = sshra.s32 %s317_s29, 4  ;;  %s502_s5 = int_to_ptr.hbm [resolvable:$true] %s501_s5 }
  0x19   : > { %v257_v17 = vmul.f32 %v485_v0, %v408_v5  ;;  %v258_v18 = vmul.f32 %v485_v0, %v409_v7  ;;  %v416_v19 = vunpack.c.l.bf16 %v439_v10  ;;  %v432_v20 = vunpack.c.l.bf16 %v442_v11  ;;  %v443_v21 = vld [vmem:[%s218_s8 + $0x18] sm:$0xff]   ;;  %s503_s6 = scalar_lea.hbm %s502_s5, 64  ;;  %p508_p0 = scmp.lt.s32.totalorder %s502_s5, %s689_s4 }
  0x1a   : > { %v259_v22 = vmul.f32 %v485_v0, %v412_v12  ;;  %v260_v23 = vmul.f32 %v485_v0, %v413_v14  ;;  %v417_v24 = vunpack.c.h.bf16 %v439_v10  ;;  %v433_v25 = vunpack.c.h.bf16 %v442_v11  ;;  %p504_p11 = scmp.ne.s32.totalorder %s502_s5, %s503_s6  ;;  %p509_p1 = scmp.lt.s32.totalorder %s507_s9, %s503_s6 }
  0x1b   : > { %v269_v26 = vadd.f32 %v639_v1, %v257_v17  ;;  %v270_v27 = vadd.f32 %v639_v1, %v258_v18  ;;  %v261_v28 = vmul.f32 %v485_v0, %v416_v19  ;;  %v420_v29 = vunpack.c.l.bf16 %v440_v16 }
  0x1c   : > { %v271_v30 = vadd.f32 %v639_v1, %v259_v22  ;;  %v272_v31 = vadd.f32 %v639_v1, %v260_v23  ;;  %v262_v32 = vmul.f32 %v485_v0, %v417_v24  ;;  %v436_v33 = vunpack.c.l.bf16 %v443_v21  ;;  %p505_p12 = pnand %p504_p11, %p616_p5  ;;  %p510_p2 = por %p509_p1, %p508_p0 }
  0x1d   : > { %v277_v34 = vadd.f32 %v424_v6, %v269_v26  ;;  %v278_v35 = vadd.f32 %v425_v8, %v270_v27  ;;  %v273_v36 = vadd.f32 %v639_v1, %v261_v28  ;;  %v263_v37 = vmul.f32 %v485_v0, %v420_v29 }
  0x1e   : > { %v279_v38 = vadd.f32 %v428_v13, %v271_v30  ;;  %v280_v39 = vadd.f32 %v429_v15, %v272_v31  ;;  %v274_v40 = vadd.f32 %v639_v1, %v262_v32  ;;  %v421_v41 = vunpack.c.h.bf16 %v440_v16  ;;  %p506_p13 = pneg %p505_p12 }
  0x1f   : > { %v285_v42 = vmax.f32 %v277_v34, 0.0  ;;  %v286_v43 = vmax.f32 %v278_v35, 0.0  ;;  %v281_v44 = vadd.f32 %v432_v20, %v273_v36  ;;  %v275_v45 = vadd.f32 %v639_v1, %v263_v37 }
  0x20   : > { %v287_v46 = vmax.f32 %v279_v38, 0.0  ;;  %v288_v47 = vmax.f32 %v280_v39, 0.0  ;;  %v282_v48 = vadd.f32 %v433_v25, %v274_v40  ;;  %v437_v51 = vunpack.c.h.bf16 %v443_v21  ;;  %p511_p3 = pnand %p510_p2, %p506_p13 }
  0x21   : > { %293 = vst [vmem:[%s207_s22] sm:$0xff] %v285_v42  ;;  %v289_v49 = vmax.f32 %v281_v44, 0.0  ;;  %v283_v50 = vadd.f32 %v436_v33, %v275_v45  ;;  %v264_v52 = vmul.f32 %v485_v0, %v421_v41 }
  0x22   : > { %294 = vst [vmem:[%s207_s22 + $0x8] sm:$0xff] %v286_v43  ;;  %v290_v53 = vmax.f32 %v282_v48, 0.0 }
  0x23   : > { %295 = vst [vmem:[%s207_s22 + $0x10] sm:$0xff] %v287_v46  ;;  %v291_v54 = vmax.f32 %v283_v50, 0.0  ;;  %v276_v55 = vadd.f32 %v639_v1, %v264_v52 }
  0x24   : > { %296 = vst [vmem:[%s207_s22 + $0x18] sm:$0xff] %v288_v47 }
  0x25   : > { %297 = vst [vmem:[%s207_s22 + $0x20] sm:$0xff] %v289_v49  ;;  %v284_v56 = vadd.f32 %v437_v51, %v276_v55 }
  0x26   : > { %298 = vst [vmem:[%s207_s22 + $0x28] sm:$0xff] %v290_v53 }
  0x27   : > { %299 = vst [vmem:[%s207_s22 + $0x30] sm:$0xff] %v291_v54  ;;  %v292_v57 = vmax.f32 %v284_v56, 0.0 }
  0x29   : > { %300 = vst [vmem:[%s207_s22 + $0x38] sm:$0xff] %v292_v57 }
  0x2a   : > { %514 = shalt.err (!%p511_p3)
}
  0x2b   : > { %s551_s12 = smov 128   ;;  %s552_s13 = smov 8  }
  0x2c   : > { %444 = dma.vmem_to_hbm [thread:$0]  (%p616_p5), %s315_s19, 1024, %s317_s29, %s302_s30, %s551_s12, %s551_s12, %s552_s13  }
  0x2d PF: > { %p450_p4 = scmp.ge.s32.totalorder %s549_s18, 2  ;;  %s331_s14 = sand.u32 1, %s537_s15  }
  0x2e   : > { %s332_s20 = scalar_lea.sflag [#allocation3], %s331_s14 }
  0x2f   : > { %p447_p7 = pnand %p450_p4, %p620_p6 }
  0x31   : > { %p448_p8 = pneg %p447_p7 }
  0x33   : > { %532 = dma.done.wait (%p448_p8), %s332_s20, 1024  }
  0x34   : > { %534 = vsyncadd (%p448_p8), %s332_s20, 4294966272  ;;  %p14_p9 = scmp.ge.s32.totalorder %s603_s21, 4   ;;  %s692_s15 = smov %s541_s16 }
  0x35   : > { %s693_s16 = smov %s545_s17  ;;  %s694_s17 = smov %s614_s24 }
  0x36   : > { %s695_s18 = smov %s603_s21  ;;  %16 = sbr.rel (!%p14_p9) target bundleno = 3 (0x3), region = 74 }
  0x3b   :  { %338 = vsyncpa [#allocation3], 1 }
  0x3c   :  { %340 = vsyncpa [#allocation3 + $0x1], 1 }

// kernel: resblock_apply.7
= control target key start
LH: loop header
LB: loop body
LE: loop exit
PB: predicated region body
PF: predicated region fallthrough
CT: control target
= control target key end

     0   :  { %s2276_s18 = smov 0   ;;  %s2278_s19 = smov 0   ;;  %s2662_s0 = inlined_call_operand.vmem [shape: bf16[128,1152], index: 0, kind: input, shape index: {}]   ;;  %s2663_s1 = inlined_call_operand.vmem [shape: bf16[1152,128], index: 1, kind: input, shape index: {}]   ;;  %s2664_s2 = inlined_call_operand.vmem [shape: f32[1,128], index: 2, kind: input, shape index: {}]   ;;  %s2665_s3 = inlined_call_operand.vmem [shape: bf16[128,128], index: 3, kind: output, shape index: {0}]   ;;  %s2666_s4 = inlined_call_operand.vmem [shape: f32[2,1,128], index: 4, kind: output, shape index: {1}]   ;;  %s2667_s5 = inlined_call_operand.vmem [shape: f32[2,1,128], index: 5, kind: output, shape index: {2}]  }
   0x1   :  { %s2280_s20 = smov 0  }
   0x2 LB: > { %s28_s21 = sadd.s32 1, %s2240_s19  ;;  %p1610_p0 = scmp.ge.s32.totalorder %s2244_s20, 1  ;;  %s2244_s20 = sphi %s2280_s20, %s16_s20   ;;  %s2240_s19 = sphi %s2278_s19, %s2669_s19   ;;  %s2236_s18 = sphi %s2276_s18, %s2668_s18  }
   0x3   : > { %p30_p1 = scmp.ge.s32.totalorder %s28_s21, 2  ;;  %p229_p2 = scmp.lt.s32.totalorder %s2244_s20, 3 }
   0x5   : > { %s2671_s21 = smov (%p30_p1, %s28_s21), 0  ;;  %p230_p3 = pnand %p1610_p0, %p229_p2 }
   0x6   : > { %s1611_s13 = sshll.u32 (!%p230_p3), %s2236_s18, 3  ;;  %p303_p5 = scmp.lt.s32.totalorder (!%p230_p3), %s2236_s18, 1 }
   0x7   : > { %233 = sbr.rel (%p230_p3) target bundleno = 347 (0x15b), region = 32  ;;  %p281_p4 = scmp.lt.s32.totalorder (!%p230_p3), %s1611_s13, 15 }
   0xc   : > { %v2092_v0 = vld [vmem:[%s2663_s1 + $0x38] sm:$0xff]  ;;  %v2091_v2 = vld [vmem:[%s2663_s1 + $0x30] sm:$0xff]  ;;  %v2090_v6 = vld [vmem:[%s2663_s1 + $0x28] sm:$0xff]  ;;  %s2673_s13 = smov (!%p281_p4, %s1611_s13), 15  ;;  %s2675_s18 = smov (!%p303_p5, %s2236_s18), 1 }
   0xd   : > { %v2108_v1 = vld [vmem:[%s2663_s1 + $0xb8] sm:$0xff]  ;;  %2180 = vmatpush.bf16.msra.mxu1 %v2092_v0  ;;  %1119 = vmatpush.bf16.msra.mxu0 %v2092_v0  ;;  %v2107_v3 = vld [vmem:[%s2663_s1 + $0xb0] sm:$0xff]  ;;  %v2106_v7 = vld [vmem:[%s2663_s1 + $0xa8] sm:$0xff]  ;;  %s2196_s9 = smul.u32 36, %s2673_s13  ;;  %s308_s17 = scalar_lea.vmem %s2666_s4, %s2675_s18 }
   0xe   : > { %1177 = vmatpush.bf16.msra.mxu2 %v2108_v1  ;;  %v2116_v4 = vld [vmem:[%s2663_s1 + $0xf8] sm:$0xff]  ;;  %v2115_v5 = vld [vmem:[%s2663_s1 + $0xf0] sm:$0xff]  ;;  %v2114_v8 = vld [vmem:[%s2663_s1 + $0xe8] sm:$0xff]  ;;  %s314_s25 = scalar_lea.vmem %s2667_s5, %s2675_s18 }
   0xf   : > { %1206 = vmatpush.bf16.msra.mxu3 %v2116_v4  ;;  %v2089_v9 = vld [vmem:[%s2663_s1 + $0x20] sm:$0xff]  ;;  %v2088_v12 = vld [vmem:[%s2663_s1 + $0x18] sm:$0xff]  ;;  %v2087_v15 = vld [vmem:[%s2663_s1 + $0x10] sm:$0xff]  ;;  %s2360_s23 = scalar_lea.vmem %s2662_s0, %s2196_s9 }
  0x10   : > { %v2105_v10 = vld [vmem:[%s2663_s1 + $0xa0] sm:$0xff]  ;;  %v2104_v13 = vld [vmem:[%s2663_s1 + $0x98] sm:$0xff]  ;;  %v2103_v16 = vld [vmem:[%s2663_s1 + $0x90] sm:$0xff] }
  0x11   : > { %2181 = vmatpush.bf16.msra.mxu1 %v2091_v2  ;;  %1120 = vmatpush.bf16.msra.mxu0 %v2091_v2  ;;  %v2113_v11 = vld [vmem:[%s2663_s1 + $0xe0] sm:$0xff]  ;;  %v2112_v14 = vld [vmem:[%s2663_s1 + $0xd8] sm:$0xff]  ;;  %v2111_v17 = vld [vmem:[%s2663_s1 + $0xd0] sm:$0xff] }
  0x12   : > { %1178 = vmatpush.bf16.msra.mxu2 %v2107_v3  ;;  %v2086_v18 = vld [vmem:[%s2663_s1 + $0x8] sm:$0xff]  ;;  %v2085_v20 = vld [vmem:[%s2663_s1] sm:$0xff]  ;;  %v1689_v21 = vld [vmem:[%s2360_s23 + $0x90] sm:$0xf] }
  0x13   : > { %1207 = vmatpush.bf16.msra.mxu3 %v2115_v5  ;;  %v2102_v19 = vld [vmem:[%s2663_s1 + $0x88] sm:$0xff]  ;;  %v2100_v22 = vld [vmem:[%s2663_s1 + $0x78] sm:$0xff]  ;;  %v2071_v24 = vld [vmem:[%s2360_s23 + $0xb0] sm:$0xf0] }
  0x14   : > { %v2110_v23 = vld [vmem:[%s2663_s1 + $0xc8] sm:$0xff]  ;;  %v1617_v25 = vld [vmem:[%s2360_s23] sm:$0xf]  ;;  %v2053_v26 = vld [vmem:[%s2360_s23 + $0x20] sm:$0xf0]  ;;  %v1690_v32 = vor.u32 %v2071_v24, %v1689_v21 }
  0x15   : > { %2182 = vmatpush.bf16.msra.mxu1 %v2090_v6  ;;  %1121 = vmatpush.bf16.msra.mxu0 %v2090_v6  ;;  %v2101_v27 = vld [vmem:[%s2663_s1 + $0x80] sm:$0xff]  ;;  %v1625_v28 = vld [vmem:[%s2360_s23 + $0x8] sm:$0xf]  ;;  %v2054_v29 = vld [vmem:[%s2360_s23 + $0x28] sm:$0xf0]  ;;  %v1618_v33 = vor.u32 %v2053_v26, %v1617_v25 }
  0x16   : > { %1179 = vmatpush.bf16.msra.mxu2 %v2106_v7  ;;  %v2124_v30 = vld [vmem:[%s2663_s1 + $0x138] sm:$0xff]  ;;  %v1626_v34 = vor.u32 %v2054_v29, %v1625_v28  ;;  %v2109_v35 = vld [vmem:[%s2663_s1 + $0xc0] sm:$0xff]  ;;  %v2050_v36 = vld [vmem:[%s2360_s23 + $0xc] sm:$0xf] }
  0x17   : > { %1208 = vmatpush.bf16.msra.mxu3 %v2114_v8  ;;  %v2140_v31 = vld [vmem:[%s2663_s1 + $0x1b8] sm:$0xff]  ;;  %v1627_v37 = vld [vmem:[%s2360_s23 + $0x2c] sm:$0xf0]  ;;  %v2098_v43 = vld [vmem:[%s2663_s1 + $0x68] sm:$0xff] }
  0x18   : > { %v2099_v38 = vld [vmem:[%s2663_s1 + $0x70] sm:$0xff]  ;;  %v2148_v39 = vld [vmem:[%s2663_s1 + $0x1f8] sm:$0xff]  ;;  %v1630_v42 = vor.u32 %v2050_v36, %v1627_v37  ;;  %v2122_v45 = vld [vmem:[%s2663_s1 + $0x128] sm:$0xff] }
  0x19   : > { %2183 = vmatpush.bf16.msra.mxu1 %v2089_v9  ;;  %1122 = vmatpush.bf16.msra.mxu0 %v2089_v9  ;;  %v2123_v40 = vld [vmem:[%s2663_s1 + $0x130] sm:$0xff]  ;;  %v2138_v46 = vld [vmem:[%s2663_s1 + $0x1a8] sm:$0xff]  ;;  %v2097_v47 = vld [vmem:[%s2663_s1 + $0x60] sm:$0xff] }
  0x1a   : > { %1180 = vmatpush.bf16.msra.mxu2 %v2105_v10  ;;  %v2139_v41 = vld [vmem:[%s2663_s1 + $0x1b0] sm:$0xff]  ;;  %v2146_v48 = vld [vmem:[%s2663_s1 + $0x1e8] sm:$0xff]  ;;  %v2121_v49 = vld [vmem:[%s2663_s1 + $0x120] sm:$0xff] }
  0x1b   : > { %1209 = vmatpush.bf16.msra.mxu3 %v2113_v11  ;;  %v2147_v44 = vld [vmem:[%s2663_s1 + $0x1f0] sm:$0xff]  ;;  %v2137_v50 = vld [vmem:[%s2663_s1 + $0x1a0] sm:$0xff]  ;;  %v1725_v51 = vld [vmem:[%s2360_s23 + $0xd8] sm:$0xf] }
  0x1c   : > { %v2080_v52 = vld [vmem:[%s2360_s23 + $0xf8] sm:$0xf0]  ;;  %v1653_v53 = vld [vmem:[%s2360_s23 + $0x48] sm:$0xf]  ;;  %v2062_v54 = vld [vmem:[%s2360_s23 + $0x68] sm:$0xf0] }
  0x1d   : > { %2184 = vmatpush.bf16.msra.mxu1 %v2088_v12  ;;  %1123 = vmatpush.bf16.msra.mxu0 %v2088_v12  ;;  %v2096_v55 = vld [vmem:[%s2663_s1 + $0x58] sm:$0xff]  ;;  %v1661_v56 = vld [vmem:[%s2360_s23 + $0x50] sm:$0xf]  ;;  %v2063_v57 = vld [vmem:[%s2360_s23 + $0x70] sm:$0xf0]  ;;  %v1726_v59 = vor.u32 %v2080_v52, %v1725_v51  ;;  %v1654_v60 = vor.u32 %v2062_v54, %v1653_v53 }
  0x1e   : > { %1181 = vmatpush.bf16.msra.mxu2 %v2104_v13  ;;  %v2120_v58 = vld [vmem:[%s2663_s1 + $0x118] sm:$0xff]  ;;  %v1662_v61 = vor.u32 %v2063_v57, %v1661_v56  ;;  %v2059_v62 = vld [vmem:[%s2360_s23 + $0x54] sm:$0xf]  ;;  %v2094_v4 = vld [vmem:[%s2663_s1 + $0x48] sm:$0xff] }
  0x1f   : > { %1210 = vmatpush.bf16.msra.mxu3 %v2112_v14  ;;  %v1663_v63 = vld [vmem:[%s2360_s23 + $0x74] sm:$0xf0]  ;;  %v2095_v0 = vld [vmem:[%s2663_s1 + $0x50] sm:$0xff]  ;;  %v2145_v5 = vld [vmem:[%s2663_s1 + $0x1e0] sm:$0xff] }
  0x20   : > { %v2119_v1 = vld [vmem:[%s2663_s1 + $0x110] sm:$0xff]  ;;  %v1666_v2 = vor.u32 %v2059_v62, %v1663_v63  ;;  %v2136_v3 = vld [vmem:[%s2663_s1 + $0x198] sm:$0xff]  ;;  %v2118_v6 = vld [vmem:[%s2663_s1 + $0x108] sm:$0xff] }
  0x21   : > { %2185 = vmatpush.bf16.msra.mxu1 %v2087_v15  ;;  %1124 = vmatpush.bf16.msra.mxu0 %v2087_v15  ;;  %v2135_v7 = vld [vmem:[%s2663_s1 + $0x190] sm:$0xff]  ;;  %v2144_v8 = vld [vmem:[%s2663_s1 + $0x1d8] sm:$0xff]  ;;  %v2093_v9 = vld [vmem:[%s2663_s1 + $0x40] sm:$0xff] }
  0x22   : > { %1182 = vmatpush.bf16.msra.mxu2 %v2103_v16  ;;  %v2132_v10 = vld [vmem:[%s2663_s1 + $0x178] sm:$0xff]  ;;  %v2117_v11 = vld [vmem:[%s2663_s1 + $0x100] sm:$0xff]  ;;  %v1619_v14 = vld [vmem:[%s2360_s23 + $0x24] sm:$0xf0] }
  0x23   : > { %1211 = vmatpush.bf16.msra.mxu3 %v2111_v17  ;;  %v2049_v12 = vld [vmem:[%s2360_s23 + $0x4] sm:$0xf]  ;;  %v2156_v13 = vld [vmem:[%s2663_s1 + $0x238] sm:$0xff]  ;;  %v1633_v15 = vld [vmem:[%s2360_s23 + $0x10] sm:$0xf] }
  0x24   : > { %v2055_v16 = vld [vmem:[%s2360_s23 + $0x30] sm:$0xf0]  ;;  %v1697_v17 = vld [vmem:[%s2360_s23 + $0x98] sm:$0xf]  ;;  %v1699_v24 = vld [vmem:[%s2360_s23 + $0xbc] sm:$0xf0] }
  0x25   : > { %2186 = vmatpush.bf16.msra.mxu1 %v2086_v18  ;;  %1125 = vmatpush.bf16.msra.mxu0 %v2086_v18  ;;  %v2072_v18 = vld [vmem:[%s2360_s23 + $0xb8] sm:$0xf0]  ;;  %v1634_v21 = vor.u32 %v2055_v16, %v1633_v15  ;;  %v2155_v25 = vld [vmem:[%s2663_s1 + $0x230] sm:$0xff]  ;;  %v2130_v26 = vld [vmem:[%s2663_s1 + $0x168] sm:$0xff] }
  0x26   : > { %1183 = vmatpush.bf16.msra.mxu2 %v2102_v19  ;;  %v2131_v19 = vld [vmem:[%s2663_s1 + $0x170] sm:$0xff]  ;;  %v2154_v29 = vld [vmem:[%s2663_s1 + $0x228] sm:$0xff]  ;;  %v2141_v51 = vld [vmem:[%s2663_s1 + $0x1c0] sm:$0xff] }
  0x27   : > { %1212 = vmatpush.bf16.msra.mxu3 %v2110_v23  ;;  %v2068_v23 = vld [vmem:[%s2360_s23 + $0x9c] sm:$0xf]  ;;  %v2058_v36 = vld [vmem:[%s2360_s23 + $0x4c] sm:$0xf]  ;;  %v1655_v37 = vld [vmem:[%s2360_s23 + $0x6c] sm:$0xf0] }
  0x28   : > { %v1702_v28 = vor.u32 %v2068_v23, %v1699_v24  ;;  %v2125_v52 = vld [vmem:[%s2663_s1 + $0x140] sm:$0xff]  ;;  %v2151_v53 = vld [vmem:[%s2663_s1 + $0x210] sm:$0xff]  ;;  %v2150_v54 = vld [vmem:[%s2663_s1 + $0x208] sm:$0xff] }
  0x29   : > { %2187 = vmatpush.bf16.msra.mxu1 %v2085_v20  ;;  %1126 = vmatpush.bf16.msra.mxu0 %v2085_v20  ;;  %v1622_v20 = vor.u32 %v2049_v12, %v1619_v14  ;;  %v1691_v56 = vld [vmem:[%s2360_s23 + $0xb4] sm:$0xf0]  ;;  %v1705_v57 = vld [vmem:[%s2360_s23 + $0xa0] sm:$0xf]  ;;  %v1679_v14 = vld [vmem:[%s2360_s23 + $0x84] sm:$0xf0] }
  0x2a   : > { %1184 = vmatpush.bf16.msra.mxu2 %v2101_v27  ;;  %v2134_v27 = vld [vmem:[%s2663_s1 + $0x188] sm:$0xff]  ;;  %v2051_v16 = vld [vmem:[%s2360_s23 + $0x14] sm:$0xf] }
  0x2b   : > { %1213 = vmatpush.bf16.msra.mxu3 %v2109_v35  ;;  %v2128_v35 = vld [vmem:[%s2663_s1 + $0x158] sm:$0xff] }
  0x2c   : > { %1137 = vmatmul.bf16.vlgmr.msra.gmra.mxu1 %v1690_v32  ;;  %1127 = vmatmul.bf16.vlgmr.msra.gmra.mxu0 %v1618_v33  ;;  %v2129_v32 = vld [vmem:[%s2663_s1 + $0x160] sm:$0xff] }
  0x2d   : > { %1148 = vmatpush.bf16.msrb.mxu1 %v2100_v22  ;;  %1235 = vmatpush.bf16.msrb.mxu0 %v2124_v30  ;;  %v1698_v22 = vor.u32 %v2072_v18, %v1697_v17  ;;  %v2133_v30 = vld [vmem:[%s2663_s1 + $0x180] sm:$0xff]  ;;  %v1635_v17 = vld [vmem:[%s2360_s23 + $0x34] sm:$0xf0] }
  0x2e   : > { %1293 = vmatpush.bf16.msrb.mxu2 %v2140_v31  ;;  %1214 = vmatmul.bf16.vlgmr.msra.gmra.mxu3 %v1630_v42  ;;  %v2143_v31 = vld [vmem:[%s2663_s1 + $0x1d0] sm:$0xff]  ;;  %v2153_v33 = vld [vmem:[%s2663_s1 + $0x220] sm:$0xff] }
  0x2f   : > { %1185 = vmatmul.bf16.vlgmr.msra.gmra.mxu2 %v1626_v34  ;;  %1322 = vmatpush.bf16.msrb.mxu3 %v2148_v39  ;;  %v2142_v34 = vld [vmem:[%s2663_s1 + $0x1c8] sm:$0xff]  ;;  %v2064_v39 = vld [vmem:[%s2360_s23 + $0x78] sm:$0xf0]  ;;  %v2127_v42 = vld [vmem:[%s2663_s1 + $0x150] sm:$0xff] }
  0x30   : > { %v1649_v18 = vld [vmem:[%s2360_s23 + $0x20] sm:$0xf] }
  0x31   : > { %1149 = vmatpush.bf16.msrb.mxu1 %v2099_v38  ;;  %1236 = vmatpush.bf16.msrb.mxu0 %v2123_v40  ;;  %v1669_v38 = vld [vmem:[%s2360_s23 + $0x58] sm:$0xf]  ;;  %v1733_v40 = vld [vmem:[%s2360_s23 + $0xe0] sm:$0xf] }
  0x32   : > { %1294 = vmatpush.bf16.msrb.mxu2 %v2139_v41  ;;  %v2081_v41 = vld [vmem:[%s2360_s23 + $0x100] sm:$0xf0] }
  0x33   : > { %1323 = vmatpush.bf16.msrb.mxu3 %v2147_v44  ;;  %v1670_v44 = vor.u32 %v2064_v39, %v1669_v38  ;;  %v1751_v38 = vld [vmem:[%s2360_s23 + $0x114] sm:$0xf0] }
  0x35   : > { %1150 = vmatpush.bf16.msrb.mxu1 %v2098_v43  ;;  %1237 = vmatpush.bf16.msrb.mxu0 %v2122_v45  ;;  %v1658_v43 = vor.u32 %v2058_v36, %v1655_v37  ;;  %v1734_v45 = vor.u32 %v2081_v41, %v1733_v40  ;;  %v2079_v37 = vld [vmem:[%s2360_s23 + $0xf4] sm:$0xf]  ;;  %v2069_v40 = vld [vmem:[%s2360_s23 + $0xa4] sm:$0xf]  ;;  %v1707_v41 = vld [vmem:[%s2360_s23 + $0xc4] sm:$0xf0] }
  0x36   : > { %1295 = vmatpush.bf16.msrb.mxu2 %v2138_v46  ;;  %v2077_v46 = vld [vmem:[%s2360_s23 + $0xe4] sm:$0xf]  ;;  %v1754_v39 = vor.u32 %v2079_v37, %v1751_v38 }
  0x37   : > { %1324 = vmatpush.bf16.msrb.mxu3 %v2146_v48 }
  0x39   : > { %1151 = vmatpush.bf16.msrb.mxu1 %v2097_v47  ;;  %1238 = vmatpush.bf16.msrb.mxu0 %v2121_v49  ;;  %v1735_v47 = vld [vmem:[%s2360_s23 + $0x104] sm:$0xf0] }
  0x3a   : > { %1296 = vmatpush.bf16.msrb.mxu2 %v2137_v50  ;;  %v1738_v48 = vor.u32 %v2077_v46, %v1735_v47  ;;  %v2126_v49 = vld [vmem:[%s2663_s1 + $0x148] sm:$0xff]  ;;  %v2152_v50 = vld [vmem:[%s2663_s1 + $0x218] sm:$0xff]  ;;  %v1710_v46 = vor.u32 %v2069_v40, %v1707_v41 }
  0x3b   : > { %1325 = vmatpush.bf16.msrb.mxu3 %v2145_v5  ;;  %v1727_v5 = vld [vmem:[%s2360_s23 + $0xfc] sm:$0xf0] }
  0x3c   : > { %1142 = vmatmul.bf16.gmra.mxu1 %v1726_v59  ;;  %1132 = vmatmul.bf16.gmra.mxu0 %v1654_v60  ;;  %v1641_v59 = vld [vmem:[%s2360_s23 + $0x18] sm:$0xf]  ;;  %v2056_v60 = vld [vmem:[%s2360_s23 + $0x38] sm:$0xf0] }
  0x3d   : > { %1152 = vmatpush.bf16.msrb.mxu1 %v2096_v55  ;;  %1239 = vmatpush.bf16.msrb.mxu0 %v2120_v58  ;;  %v2067_v55 = vld [vmem:[%s2360_s23 + $0x94] sm:$0xf]  ;;  %v2073_v58 = vld [vmem:[%s2360_s23 + $0xc0] sm:$0xf0]  ;;  %v1642_v63 = vor.u32 %v2056_v60, %v1641_v59 }
  0x3e   : > { %1297 = vmatpush.bf16.msrb.mxu2 %v2136_v3  ;;  %1219 = vmatmul.bf16.gmra.mxu3 %v1666_v2  ;;  %v1706_v62 = vor.u32 %v2073_v58, %v1705_v57  ;;  %v2149_v3 = vld [vmem:[%s2663_s1 + $0x200] sm:$0xff] }
  0x3f   : > { %1190 = vmatmul.bf16.gmra.mxu2 %v1662_v61  ;;  %1326 = vmatpush.bf16.msrb.mxu3 %v2144_v8  ;;  %v1694_v61 = vor.u32 %v2067_v55, %v1691_v56  ;;  %v1677_v8 = vld [vmem:[%s2360_s23 + $0x60] sm:$0xf]  ;;  %v2078_v55 = vld [vmem:[%s2360_s23 + $0xec] sm:$0xf]  ;;  %v1743_v56 = vld [vmem:[%s2360_s23 + $0x10c] sm:$0xf0] }
  0x40   : > { %v1746_v57 = vor.u32 %v2078_v55, %v1743_v56 }
  0x41   : > { %1153 = vmatpush.bf16.msrb.mxu1 %v2095_v0  ;;  %1240 = vmatpush.bf16.msrb.mxu0 %v2119_v1  ;;  %v2052_v0 = vld [vmem:[%s2360_s23 + $0x1c] sm:$0xf]  ;;  %v1643_v1 = vld [vmem:[%s2360_s23 + $0x3c] sm:$0xf0] }
  0x42   : > { %1298 = vmatpush.bf16.msrb.mxu2 %v2135_v7  ;;  %v1646_v2 = vor.u32 %v2052_v0, %v1643_v1  ;;  %v2082_v7 = vld [vmem:[%s2360_s23 + $0x108] sm:$0xf0] }
  0x43   : > { %1327 = vmatpush.bf16.msrb.mxu3 %v2143_v31  ;;  %v2066_v31 = vld [vmem:[%s2360_s23 + $0x88] sm:$0xf0] }
  0x45   : > { %1154 = vmatpush.bf16.msrb.mxu1 %v2094_v4  ;;  %1241 = vmatpush.bf16.msrb.mxu0 %v2118_v6  ;;  %v2076_v4 = vld [vmem:[%s2360_s23 + $0xdc] sm:$0xf]  ;;  %v1741_v6 = vld [vmem:[%s2360_s23 + $0xe8] sm:$0xf] }
  0x46   : > { %1299 = vmatpush.bf16.msrb.mxu2 %v2134_v27 }
  0x47   : > { %1328 = vmatpush.bf16.msrb.mxu3 %v2142_v34 }
  0x49   : > { %1155 = vmatpush.bf16.msrb.mxu1 %v2093_v9  ;;  %1242 = vmatpush.bf16.msrb.mxu0 %v2117_v11  ;;  %v2065_v9 = vld [vmem:[%s2360_s23 + $0x80] sm:$0xf0]  ;;  %v1742_v11 = vor.u32 %v2082_v7, %v1741_v6 }
  0x4a   : > { %1300 = vmatpush.bf16.msrb.mxu2 %v2133_v30  ;;  %v1678_v12 = vor.u32 %v2065_v9, %v1677_v8  ;;  %v1685_v30 = vld [vmem:[%s2360_s23 + $0x68] sm:$0xf] }
  0x4b   : > { %1329 = vmatpush.bf16.msrb.mxu3 %v2141_v51 }
  0x4c   : > { %1156 = vmatmul.bf16.vlgmr.msrb.gmra.mxu1 %v1622_v20  ;;  %1243 = vmatmul.bf16.vlgmr.msrb.gmra.mxu0 %v1634_v21  ;;  %v1713_v20 = vld [vmem:[%s2360_s23 + $0xa8] sm:$0xf]  ;;  %v2074_v21 = vld [vmem:[%s2360_s23 + $0xc8] sm:$0xf0] }
  0x4d   : > { %1264 = vmatpush.bf16.msra.mxu1 %v2132_v10  ;;  %1351 = vmatpush.bf16.msra.mxu0 %v2156_v13  ;;  %v1730_v10 = vor.u32 %v2076_v4, %v1727_v5  ;;  %v1714_v24 = vor.u32 %v2074_v21, %v1713_v20 }
  0x4e   : > { %1224 = vmatmul.bf16.gmra.mxu3 %v1702_v28  ;;  %2188 = vmatpush.bf16.msra.mxu2 %v2156_v13  ;;  %v2061_v13 = vld [vmem:[%s2360_s23 + $0x64] sm:$0xf]  ;;  %v2060_v28 = vld [vmem:[%s2360_s23 + $0x5c] sm:$0xf] }
  0x4f   : > { %1195 = vmatmul.bf16.gmra.mxu2 %v1698_v22  ;;  %v1682_v15 = vor.u32 %v2061_v13, %v1679_v14  ;;  %v1638_v22 = vor.u32 %v2051_v16, %v1635_v17 }
  0x51   : > { %1265 = vmatpush.bf16.msra.mxu1 %v2131_v19  ;;  %1352 = vmatpush.bf16.msra.mxu0 %v2155_v25  ;;  %v2057_v19 = vld [vmem:[%s2360_s23 + $0x40] sm:$0xf0] }
  0x52   : > { %2189 = vmatpush.bf16.msra.mxu2 %v2155_v25  ;;  %v1650_v23 = vor.u32 %v2057_v19, %v1649_v18  ;;  %v2070_v25 = vld [vmem:[%s2360_s23 + $0xac] sm:$0xf] }
  0x55   : > { %1266 = vmatpush.bf16.msra.mxu1 %v2130_v26  ;;  %1353 = vmatpush.bf16.msra.mxu0 %v2154_v29  ;;  %v1715_v26 = vld [vmem:[%s2360_s23 + $0xcc] sm:$0xf0] }
  0x56   : > { %2190 = vmatpush.bf16.msra.mxu2 %v2154_v29  ;;  %v1718_v27 = vor.u32 %v2070_v25, %v1715_v26  ;;  %v1671_v29 = vld [vmem:[%s2360_s23 + $0x7c] sm:$0xf0] }
  0x57   : > { %v1674_v34 = vor.u32 %v2060_v28, %v1671_v29 }
  0x59   : > { %1267 = vmatpush.bf16.msra.mxu1 %v2129_v32  ;;  %1354 = vmatpush.bf16.msra.mxu0 %v2153_v33  ;;  %v1749_v32 = vld [vmem:[%s2360_s23 + $0xf0] sm:$0xf] }
  0x5a   : > { %2191 = vmatpush.bf16.msra.mxu2 %v2153_v33  ;;  %v2083_v33 = vld [vmem:[%s2360_s23 + $0x110] sm:$0xf0] }
  0x5b   : > { %v1750_v36 = vor.u32 %v2083_v33, %v1749_v32 }
  0x5c   : > { %1161 = vmatmul.bf16.gmra.mxu1 %v1658_v43  ;;  %1248 = vmatmul.bf16.gmra.mxu0 %v1670_v44  ;;  %v2075_v43 = vld [vmem:[%s2360_s23 + $0xd0] sm:$0xf0]  ;;  %v1757_v44 = vld [vmem:[%s2360_s23 + $0xf8] sm:$0xf] }
  0x5d   : > { %1268 = vmatpush.bf16.msra.mxu1 %v2128_v35  ;;  %1355 = vmatpush.bf16.msra.mxu0 %v2152_v50  ;;  %v1686_v35 = vor.u32 %v2066_v31, %v1685_v30 }
  0x5e   : > { %1229 = vmatmul.bf16.gmra.mxu3 %v1738_v48  ;;  %2192 = vmatpush.bf16.msra.mxu2 %v2152_v50 }
  0x5f   : > { %1200 = vmatmul.bf16.gmra.mxu2 %v1734_v45  ;;  %v2084_v45 = vld [vmem:[%s2360_s23 + $0x118] sm:$0xf0] }
  0x60   : > { %v1758_v50 = vor.u32 %v2084_v45, %v1757_v44 }
  0x61   : > { %1269 = vmatpush.bf16.msra.mxu1 %v2127_v42  ;;  %1356 = vmatpush.bf16.msra.mxu0 %v2151_v53  ;;  %v1721_v42 = vld [vmem:[%s2360_s23 + $0xb0] sm:$0xf]  ;;  %s1614_s23 = sshll.u32 %s2673_s13, 2 }
  0x62   : > { %2193 = vmatpush.bf16.msra.mxu2 %v2151_v53  ;;  %v1722_v47 = vor.u32 %v2075_v43, %v1721_v42  ;;  %s2627_s15 = scalar_lea.vmem %s2665_s3, %s1614_s23 }
  0x65   : > { %1270 = vmatpush.bf16.msra.mxu1 %v2126_v49  ;;  %1357 = vmatpush.bf16.msra.mxu0 %v2150_v54 }
  0x66   : > { %2194 = vmatpush.bf16.msra.mxu2 %v2150_v54 }
  0x69   : > { %1271 = vmatpush.bf16.msra.mxu1 %v2125_v52  ;;  %1358 = vmatpush.bf16.msra.mxu0 %v2149_v3 }
  0x6a   : > { %2195 = vmatpush.bf16.msra.mxu2 %v2149_v3 }
  0x6c   : > { %1166 = vmatmul.bf16.gmra.mxu1 %v1694_v61  ;;  %1253 = vmatmul.bf16.gmra.mxu0 %v1706_v62 }
  0x6e   : > { %1330 = vmatmul.bf16.vlgmr.msrb.gmra.mxu3 %v1646_v2  ;;  %v2221_v2 = vld [vmem:[%s2664_s2] ss:$0 sm:$0xff] }
  0x6f   : > { %1301 = vmatmul.bf16.vlgmr.msrb.gmra.mxu2 %v1642_v63 }
  0x7c   : > { %1171 = vmatmul.bf16.gmra.mxu1 %v1730_v10  ;;  %1258 = vmatmul.bf16.gmra.mxu0 %v1742_v11 }
  0x7e   : > { %1335 = vmatmul.bf16.gmra.mxu3 %v1682_v15 }
  0x7f   : > { %1306 = vmatmul.bf16.gmra.mxu2 %v1678_v12 }
  0x8c   : > { %1272 = vmatmul.bf16.vlgmr.msra.gmra.mxu1 %v1638_v22  ;;  %1359 = vmatmul.bf16.vlgmr.msra.gmra.mxu0 %v1650_v23 }
  0x8e   : > { %1340 = vmatmul.bf16.gmra.mxu3 %v1718_v27 }
  0x8f   : > { %1311 = vmatmul.bf16.gmra.mxu2 %v1714_v24 }
  0x9c   : > { %1277 = vmatmul.bf16.gmra.mxu1 %v1674_v34  ;;  %1364 = vmatmul.bf16.gmra.mxu0 %v1686_v35 }
  0x9e   : > { %1345 = vmatmul.bf16.gmra.mxu3 %v1754_v39 }
  0x9f   : > { %1316 = vmatmul.bf16.gmra.mxu2 %v1750_v36 }
  0xa9   : > { %v1138_v48 = vpop.f32.mrf.mxu1  ;;  %v1128_v49 = vpop.f32.mrf.mxu0 }
  0xaa   : > { %v1129_v3 = vadd.f32 %v2221_v2, %v1128_v49  ;;  %v1139_v34 = vadd.f32 %v2221_v2, %v1138_v48 }
  0xac   : > { %1282 = vmatmul.bf16.gmra.mxu1 %v1710_v46  ;;  %1369 = vmatmul.bf16.gmra.mxu0 %v1722_v47 }
  0xaf   : > { %1374 = vmatmul.bf16.vlgmr.msra.gmra.mxu2 %v1758_v50 }
  0xb1   : > { %v1140_v52 = vpop.f32.mrf.mxu1  ;;  %v1130_v53 = vpop.f32.mrf.mxu0 }
  0xb2   : > { %v1186_v51 = vpop.f32.mrf.mxu2  ;;  %v1215_v54 = vpop.f32.mrf.mxu3  ;;  %v1131_v11 = vadd.f32 %v2221_v2, %v1130_v53  ;;  %v1141_v42 = vadd.f32 %v2221_v2, %v1140_v52 }
  0xb9   : > { %v1143_v59 = vpop.f32.mrf.mxu1  ;;  %v1133_v60 = vpop.f32.mrf.mxu0 }
  0xba   : > { %v1188_v58 = vpop.f32.mrf.mxu2  ;;  %v2593_v61 = vpop.f32.mrf.mxu3  ;;  %v1134_v19 = vadd.f32 %v2221_v2, %v1133_v60  ;;  %v1144_v48 = vadd.f32 %v2221_v2, %v1143_v59 }
  0xbc   : > { %1287 = vmatmul.bf16.gmra.mxu1 %v1746_v57 }
  0xc1   : > { %v1145_v63 = vpop.f32.mrf.mxu1  ;;  %v1135_v0 = vpop.f32.mrf.mxu0 }
  0xc2   : > { %v1191_v62 = vpop.f32.mrf.mxu2  ;;  %v1220_v1 = vpop.f32.mrf.mxu3  ;;  %v1136_v26 = vadd.f32 %v2221_v2, %v1135_v0  ;;  %v1146_v57 = vadd.f32 %v2221_v2, %v1145_v63 }
  0xc9   : > { %v1157_v5 = vpop.f32.mrf.mxu1  ;;  %v1244_v6 = vpop.f32.mrf.mxu0 }
  0xca   : > { %v1193_v4 = vpop.f32.mrf.mxu2  ;;  %v1158_v7 = vadd.f32 %v1157_v5, %v1129_v3  ;;  %v2598_v9 = vpop.f32.mrf.mxu3 }
  0xcc   : > { %v1187_v8 = vadd.f32 %v1186_v51, %v1158_v7 }
  0xce   : > { %v1216_v10 = vadd.f32 %v1215_v54, %v1187_v8 }
  0xd0   : > { %v1245_v12 = vadd.f32 %v1244_v6, %v1216_v10 }
  0xd1   : > { %v1159_v14 = vpop.f32.mrf.mxu1  ;;  %v1246_v15 = vpop.f32.mrf.mxu0 }
  0xd2   : > { %v1196_v13 = vpop.f32.mrf.mxu2  ;;  %v1160_v16 = vadd.f32 %v1159_v14, %v1131_v11  ;;  %v1225_v18 = vpop.f32.mrf.mxu3 }
  0xd4   : > { %v1189_v17 = vadd.f32 %v1188_v58, %v1160_v16 }
  0xd6   : > { %v1218_v7 = vadd.f32 %v2593_v61, %v1189_v17 }
  0xd8   : > { %v1247_v10 = vadd.f32 %v1246_v15, %v1218_v7 }
  0xd9   : > { %v1162_v21 = vpop.f32.mrf.mxu1  ;;  %v1249_v22 = vpop.f32.mrf.mxu0 }
  0xda   : > { %v1198_v20 = vpop.f32.mrf.mxu2  ;;  %v1163_v23 = vadd.f32 %v1162_v21, %v1134_v19  ;;  %v2600_v29 = vpop.f32.mrf.mxu3 }
  0xdc   : > { %v1192_v24 = vadd.f32 %v1191_v62, %v1163_v23 }
  0xde   : > { %v1221_v25 = vadd.f32 %v1220_v1, %v1192_v24 }
  0xe0   : > { %v1250_v27 = vadd.f32 %v1249_v22, %v1221_v25 }
  0xe1   : > { %v1164_v30 = vpop.f32.mrf.mxu1  ;;  %v2602_v31 = vpop.f32.mrf.mxu0 }
  0xe2   : > { %v1201_v28 = vpop.f32.mrf.mxu2  ;;  %v1165_v32 = vadd.f32 %v1164_v30, %v1136_v26  ;;  %v2604_v39 = vpop.f32.mrf.mxu3 }
  0xe4   : > { %v1194_v33 = vadd.f32 %v1193_v4, %v1165_v32 }
  0xe6   : > { %v1223_v25 = vadd.f32 %v2598_v9, %v1194_v33 }
  0xe9   : > { %v1167_v36 = vpop.f32.mrf.mxu1  ;;  %v1254_v37 = vpop.f32.mrf.mxu0 }
  0xea   : > { %v1203_v35 = vpop.f32.mrf.mxu2  ;;  %v1168_v38 = vadd.f32 %v1167_v36, %v1139_v34  ;;  %v2612_v50 = vpop.f32.mrf.mxu3 }
  0xec   : > { %v1197_v40 = vadd.f32 %v1196_v13, %v1168_v38 }
  0xee   : > { %v1226_v41 = vadd.f32 %v1225_v18, %v1197_v40 }
  0xf0   : > { %v2606_v43 = vadd.f32 %v1254_v37, %v1226_v41 }
  0xf1   : > { %v1169_v45 = vpop.f32.mrf.mxu1  ;;  %v2608_v46 = vpop.f32.mrf.mxu0 }
  0xf2   : > { %v1302_v44 = vpop.f32.mrf.mxu2  ;;  %v1170_v47 = vadd.f32 %v1169_v45, %v1141_v42  ;;  %v1331_v52 = vpop.f32.mrf.mxu3 }
  0xf4   : > { %v2610_v49 = vadd.f32 %v1198_v20, %v1170_v47 }
  0xf9   : > { %v1172_v53 = vpop.f32.mrf.mxu1  ;;  %v2614_v54 = vpop.f32.mrf.mxu0 }
  0xfa   : > { %v1304_v51 = vpop.f32.mrf.mxu2  ;;  %v1173_v55 = vadd.f32 %v1172_v53, %v1144_v48  ;;  %v1333_v3 = vpop.f32.mrf.mxu3 }
  0xfc   : > { %v2616_v56 = vadd.f32 %v1201_v28, %v1173_v55 }
 0x101   : > { %v1174_v60 = vpop.f32.mrf.mxu1  ;;  %v2618_v62 = vpop.f32.mrf.mxu0 }
 0x102   : > { %v1307_v58 = vpop.f32.mrf.mxu2  ;;  %v1175_v0 = vadd.f32 %v1174_v60, %v1146_v57  ;;  %v1336_v14 = vpop.f32.mrf.mxu3  ;;  %v1228_v57 = vadd.f32 %v2600_v29, %v2610_v49 }
 0x104   : > { %v2620_v1 = vadd.f32 %v1203_v35, %v1175_v0  ;;  %v1252_v35 = vadd.f32 %v2602_v31, %v1223_v25 }
 0x109   : > { %v1273_v4 = vpop.f32.mrf.mxu1  ;;  %v1360_v59 = vpop.f32.mrf.mxu0 }
 0x10a   : > { %v1274_v5 = vadd.f32 %v1273_v4, %v1245_v12  ;;  %v1309_v6 = vpop.f32.mrf.mxu2  ;;  %v1338_v30 = vpop.f32.mrf.mxu3 }
 0x10c   : > { %v1303_v8 = vadd.f32 %v1302_v44, %v1274_v5 }
 0x10e   : > { %v1332_v11 = vadd.f32 %v1331_v52, %v1303_v8 }
 0x110   : > { %v1361_v18 = vadd.f32 %v1360_v59, %v1332_v11 }
 0x111   : > { %v1275_v13 = vpop.f32.mrf.mxu1  ;;  %v1362_v63 = vpop.f32.mrf.mxu0 }
 0x112   : > { %v1276_v2 = vadd.f32 %v1275_v13, %v1247_v10  ;;  %v1312_v19 = vpop.f32.mrf.mxu2  ;;  %v1410_v22 = vmul.f32 %v1361_v18, %v1361_v18  ;;  %v1341_v47 = vpop.f32.mrf.mxu3 }
 0x114   : > { %v1305_v16 = vadd.f32 %v1304_v51, %v1276_v2 }
 0x116   : > { %v1334_v20 = vadd.f32 %v1333_v3, %v1305_v16  ;;  %v1257_v3 = vadd.f32 %v2608_v46, %v1228_v57 }
 0x118   : > { %v1363_v21 = vadd.f32 %v1362_v63, %v1334_v20 }
 0x119   : > { %v1278_v61 = vpop.f32.mrf.mxu1  ;;  %v1365_v12 = vpop.f32.mrf.mxu0 }
 0x11a   : > { %v2160_v15 = vpack.c.bf16 %v1363_v21, %v1361_v18  ;;  %v1396_v17 = vadd.f32 %v1363_v21, %v1361_v18  ;;  %v1411_v23 = vmul.f32 %v1363_v21, %v1363_v21  ;;  %v1279_v24 = vadd.f32 %v1278_v61, %v1250_v27  ;;  %v1314_v34 = vpop.f32.mrf.mxu2  ;;  %v1343_v59 = vpop.f32.mrf.mxu3 }
 0x11b   : > { %v1233_v21 = vadd.f32 %v2612_v50, %v2620_v1 }
 0x11c   : > { %2161 = vst [vmem:[%s2627_s15] sm:$0xff] %v2160_v15   ;;  %v1418_v26 = vadd.f32 %v1411_v23, %v1410_v22  ;;  %v1308_v28 = vadd.f32 %v1307_v58, %v1279_v24 }
 0x11e   : > { %v1337_v32 = vadd.f32 %v1336_v14, %v1308_v28 }
 0x120   : > { %v1366_v36 = vadd.f32 %v1365_v12, %v1337_v32  ;;  %v1262_v12 = vadd.f32 %v2618_v62, %v1233_v21 }
 0x121   : > { %v1280_v37 = vpop.f32.mrf.mxu1  ;;  %v1367_v38 = vpop.f32.mrf.mxu0 }
 0x122   : > { %v1397_v40 = vadd.f32 %v1396_v17, %v1366_v36  ;;  %v1412_v41 = vmul.f32 %v1366_v36, %v1366_v36  ;;  %v1281_v42 = vadd.f32 %v1280_v37, %v1252_v35  ;;  %v1317_v33 = vpop.f32.mrf.mxu2  ;;  %v1346_v20 = vpop.f32.mrf.mxu3 }
 0x124   : > { %v1419_v44 = vadd.f32 %v1418_v26, %v1412_v41  ;;  %v1310_v45 = vadd.f32 %v1309_v6, %v1281_v42 }
 0x126   : > { %v1339_v27 = vadd.f32 %v1338_v30, %v1310_v45 }
 0x128   : > { %v1368_v9 = vadd.f32 %v1367_v38, %v1339_v27 }
 0x129   : > { %v1283_v48 = vpop.f32.mrf.mxu1  ;;  %v1370_v31 = vpop.f32.mrf.mxu0 }
 0x12a   : > { %v2165_v51 = vpack.c.bf16 %v1368_v9, %v1366_v36  ;;  %v1398_v53 = vadd.f32 %v1397_v40, %v1368_v9  ;;  %v1413_v55 = vmul.f32 %v1368_v9, %v1368_v9  ;;  %v1284_v52 = vadd.f32 %v1283_v48, %v2606_v43  ;;  %v1319_v10 = vpop.f32.mrf.mxu2  ;;  %v1348_v28 = vpop.f32.mrf.mxu3 }
 0x12b   : > { %v1231_v43 = vadd.f32 %v2604_v39, %v2616_v56 }
 0x12c   : > { %2177 = vst [vmem:[%s2627_s15 + $0x8] sm:$0xff] %v2165_v51   ;;  %v1420_v58 = vadd.f32 %v1419_v44, %v1413_v55  ;;  %v1313_v60 = vadd.f32 %v1312_v19, %v1284_v52 }
 0x12d   : > { %v1260_v63 = vadd.f32 %v2614_v54, %v1231_v43 }
 0x12e   : > { %v1342_v0 = vadd.f32 %v1341_v47, %v1313_v60 }
 0x130   : > { %v1371_v4 = vadd.f32 %v1370_v31, %v1342_v0 }
 0x131   : > { %v1285_v5 = vpop.f32.mrf.mxu1  ;;  %v1372_v29 = vpop.f32.mrf.mxu0 }
 0x132   : > { %v1399_v6 = vadd.f32 %v1398_v53, %v1371_v4  ;;  %v1414_v7 = vmul.f32 %v1371_v4, %v1371_v4  ;;  %v1286_v8 = vadd.f32 %v1285_v5, %v1257_v3  ;;  %v1375_v39 = vpop.f32.mrf.mxu2 }
 0x134   : > { %v1421_v11 = vadd.f32 %v1420_v58, %v1414_v7  ;;  %v1315_v13 = vadd.f32 %v1314_v34, %v1286_v8 }
 0x136   : > { %v1344_v49 = vadd.f32 %v1343_v59, %v1315_v13 }
 0x138   : > { %v1373_v2 = vadd.f32 %v1372_v29, %v1344_v49 }
 0x139   : > { %v1288_v14 = vpop.f32.mrf.mxu1 }
 0x13a   : > { %v2170_v46 = vpack.c.bf16 %v1373_v2, %v1371_v4  ;;  %v1400_v16 = vadd.f32 %v1399_v6, %v1373_v2  ;;  %v1415_v18 = vmul.f32 %v1373_v2, %v1373_v2  ;;  %v1289_v19 = vadd.f32 %v1288_v14, %v1260_v63  ;;  %v1377_v50 = vpop.f32.mrf.mxu2 }
 0x13c   : > { %2178 = vst [vmem:[%s2627_s15 + $0x10] sm:$0xff] %v2170_v46   ;;  %v1422_v22 = vadd.f32 %v1421_v11, %v1415_v18  ;;  %v1318_v61 = vadd.f32 %v1317_v33, %v1289_v19 }
 0x13e   : > { %v1347_v56 = vadd.f32 %v1346_v20, %v1318_v61 }
 0x140   : > { %v1376_v15 = vadd.f32 %v1375_v39, %v1347_v56 }
 0x141   : > { %v1290_v54 = vpop.f32.mrf.mxu1 }
 0x142   : > { %v1401_v17 = vadd.f32 %v1400_v16, %v1376_v15  ;;  %v1416_v23 = vmul.f32 %v1376_v15, %v1376_v15  ;;  %v1291_v24 = vadd.f32 %v1290_v54, %v1262_v12 }
 0x144   : > { %v1423_v25 = vadd.f32 %v1422_v22, %v1416_v23  ;;  %v1320_v26 = vadd.f32 %v1319_v10, %v1291_v24 }
 0x146   : > { %v1349_v30 = vadd.f32 %v1348_v28, %v1320_v26 }
 0x148   : > { %v1378_v1 = vadd.f32 %v1377_v50, %v1349_v30 }
 0x14a   : > { %v2175_v32 = vpack.c.bf16 %v1378_v1, %v1376_v15  ;;  %v1402_v34 = vadd.f32 %v1401_v17, %v1378_v1  ;;  %v1417_v35 = vmul.f32 %v1378_v1, %v1378_v1 }
 0x14c   : > { %2179 = vst [vmem:[%s2627_s15 + $0x18] sm:$0xff] %v2175_v32   ;;  %v1403_v36 = vrot.slane %v1402_v34, 4  ;;  %v1424_v37 = vadd.f32 %v1423_v25, %v1417_v35 }
 0x14e   : > { %v1404_v62 = vadd.f32 %v1403_v36, %v1402_v34  ;;  %v1425_v38 = vrot.slane %v1424_v37, 4 }
 0x150   : > { %v1405_v40 = vrot.slane %v1404_v62, 2  ;;  %v1426_v41 = vadd.f32 %v1425_v38, %v1424_v37 }
 0x152   : > { %v1406_v42 = vadd.f32 %v1405_v40, %v1404_v62  ;;  %v1427_v44 = vrot.slane %v1426_v41, 2 }
 0x154   : > { %v1407_v45 = vrot.slane %v1406_v42, 1  ;;  %v1428_v27 = vadd.f32 %v1427_v44, %v1426_v41 }
 0x156   : > { %v1408_v47 = vadd.f32 %v1407_v45, %v1406_v42  ;;  %v1429_v9 = vrot.slane %v1428_v27, 1 }
 0x158   : > { %1409 = vst [vmem:[%s308_s17] sm:$0x1] %v1408_v47  ;;  %v1430_v33 = vadd.f32 %v1429_v9, %v1428_v27 }
 0x15a   : > { %1431 = vst [vmem:[%s314_s25] sm:$0x1] %v1430_v33 }
 0x15b PF: > { %s16_s20 = sadd.s32 1, %s2244_s20   ;;  %s2668_s18 = smov %s2240_s19 }
 0x15c   : > { %p13_p6 = scmp.ge.s32.totalorder %s16_s20, 4   ;;  %s2669_s19 = smov %s2671_s21 }
 0x15e   :  { %15 = sbr.rel (!%p13_p6) target bundleno = 2 (0x2), region = 92 }

</bundles_post_ra>
